<compile_context>
chip_gen: v7x
topology: tpu7x:2x2x1
jax: 0.10.0
libtpu: 0.0.40
codegen_flags: <defaults>
</compile_context>

<pallas_src>
import functools
import math

import jax
import jax.numpy as jnp
from jax.experimental import pallas as pl

# ---------------------------------------------------------------------------
# Problem sizes (small, consistent with the module: embedding divisible by nhead)
# ---------------------------------------------------------------------------
B = 2          # batch
S = 8          # sequence length
NHEAD = 5      # nhead (from the module)
EMB_HEAD = 4   # per-head dim
E = NHEAD * EMB_HEAD   # embedding_size = 20
I = 32         # internal_size of the FeedForward
EPS = 1e-5     # nn.LayerNorm default eps


def _layer_norm(x, g, b, eps=EPS):
    m = jnp.mean(x, axis=-1, keepdims=True)
    v = jnp.mean(jnp.square(x - m), axis=-1, keepdims=True)
    return (x - m) * jax.lax.rsqrt(v + eps) * g + b


# ---------------------------------------------------------------------------
# Pallas kernel: whole decoder block in one invocation (no grid).
# ---------------------------------------------------------------------------
def decoder_block_kernel(xcat_ref, wqkv_ref, bqkv_ref, wslab_ref, vec_ref,
                         out_ref, *, nbatch, seq, nhead, dhead, emb, internal):
    f32 = jnp.float32
    scale = 1.0 / math.sqrt(dhead)

    xcat = xcat_ref[...]                                   # (B*S, 3E) = [mQ|mK|mV]
    vres = xcat[:, 2 * emb:3 * emb]                        # mV residual, (B*S, E)

    # Fused per-head Q/K/V linears as ONE matmul vs block-diagonal weights.
    qkv = jnp.dot(xcat, wqkv_ref[...],
                  preferred_element_type=f32) + bqkv_ref[...]   # (B*S, 3E)

    vecs = vec_ref[...]                                    # (12, 32) packed vectors

    def vrow(i, n):
        return vecs[i:i + 1, :n]                           # (1, n) bias/gain row

    # --- per-(batch, head) scaled-dot-product attention ---------------------
    batch_rows = []
    for b in range(nbatch):
        r0 = b * seq
        head_ctx = []
        for h in range(nhead):
            c0 = h * dhead
            q = qkv[r0:r0 + seq, c0:c0 + dhead]                       # (S, D)
            k = qkv[r0:r0 + seq, emb + c0:emb + c0 + dhead]           # (S, D)
            v = qkv[r0:r0 + seq, 2 * emb + c0:2 * emb + c0 + dhead]   # (S, D)
            s = jax.lax.dot_general(q, k, (((1,), (1,)), ((), ())),
                                    preferred_element_type=f32) * scale
            s = s - jnp.max(s, axis=-1, keepdims=True)
            p = jnp.exp(s)
            p = p * pl.reciprocal(jnp.sum(p, axis=-1, keepdims=True),
                                  approx=True)
            head_ctx.append(jnp.dot(p, v, preferred_element_type=f32))  # (S, D)
        batch_rows.append(jnp.concatenate(head_ctx, axis=1))            # (S, E)
    conc = jnp.concatenate(batch_rows, axis=0)                          # (B*S, E)

    # Output projection (single full-Wo matmul) + residual + LayerNorm.
    wo = wslab_ref[3][:emb, :emb]                                       # (E, E)
    attn_out = jnp.dot(conc, wo, preferred_element_type=f32) + vrow(0, emb)
    attn = _layer_norm(attn_out + vres, vrow(1, emb), vrow(2, emb))

    # --- FeedForward: Linear -> LN -> ReLU (x2) -> Linear, residual + LN ----
    # TODO(synk): Dropout(p=1e-7) is identity (inference mode).
    w1 = wslab_ref[0][:emb, :internal]                                  # (E, I)
    w2 = wslab_ref[1][:internal, :internal]                             # (I, I)
    w3 = wslab_ref[2][:internal, :emb]                                  # (I, E)

    h1 = jnp.dot(attn, w1, preferred_element_type=f32) + vrow(3, internal)
    h1 = jnp.maximum(_layer_norm(h1, vrow(4, internal), vrow(5, internal)), 0.0)
    h2 = jnp.dot(h1, w2, preferred_element_type=f32) + vrow(6, internal)
    h2 = jnp.maximum(_layer_norm(h2, vrow(7, internal), vrow(8, internal)), 0.0)
    h3 = jnp.dot(h2, w3, preferred_element_type=f32) + vrow(9, emb)
    y = _layer_norm(h3 + attn, vrow(10, emb), vrow(11, emb))

    out_ref[...] = y.astype(out_ref.dtype)


# ---------------------------------------------------------------------------
# Wrapper: parameter packing + pallas_call
# ---------------------------------------------------------------------------
def _pack_params(p):
    f32 = jnp.float32
    H, D, Esz, Isz = NHEAD, EMB_HEAD, E, I

    eye = jnp.eye(H, dtype=f32)
    bd = lambda w: jnp.kron(eye, w.T.astype(f32))          # per-head Linear -> (E, E)

    # Block-diagonal over {Q, K, V} so [mQ|mK|mV] @ w_qkv does all projections.
    w_qkv = jnp.zeros((3 * Esz, 3 * Esz), f32)
    w_qkv = w_qkv.at[0:Esz, 0:Esz].set(bd(p["Wq"]))
    w_qkv = w_qkv.at[Esz:2 * Esz, Esz:2 * Esz].set(bd(p["Wk"]))
    w_qkv = w_qkv.at[2 * Esz:, 2 * Esz:].set(bd(p["Wv"]))
    b_qkv = jnp.concatenate([jnp.tile(p["bq"], H),
                             jnp.tile(p["bk"], H),
                             jnp.tile(p["bv"], H)]).reshape(1, 3 * Esz)

    # All remaining weights in a single (4, 32, 32) slab (zero padded).
    slab = jnp.zeros((4, Isz, Isz), f32)
    slab = slab.at[0, :Esz, :Isz].set(p["W1"].T)           # (E, I)
    slab = slab.at[1, :Isz, :Isz].set(p["W2"].T)           # (I, I)
    slab = slab.at[2, :Isz, :Esz].set(p["W3"].T)           # (I, E)
    slab = slab.at[3, :Esz, :Esz].set(p["Wo"].T)           # (E, E)

    # All biases / LayerNorm gains in a single (12, 32) array (zero padded).
    def pad_row(v):
        return jnp.zeros((Isz,), f32).at[:v.shape[0]].set(v)

    vec_names = ["bo", "ga", "ba", "b1", "gi1", "bi1",
                 "b2", "gi2", "bi2", "b3", "gf", "bf"]
    vecs = jnp.stack([pad_row(p[k]) for k in vec_names])   # (12, 32)
    return w_qkv, b_qkv, slab, vecs


def decoder_block(mK, mQ, mV, p):
    Bsz, Ssz, Esz = mK.shape
    w_qkv, b_qkv, slab, vecs = _pack_params(p)

    # Native layout, batch folded into the sublane axis; no head transposes.
    x_cat = jnp.concatenate([mQ, mK, mV], axis=-1).reshape(Bsz * Ssz, 3 * Esz)

    kernel = functools.partial(
        decoder_block_kernel, nbatch=Bsz, seq=Ssz, nhead=NHEAD,
        dhead=EMB_HEAD, emb=Esz, internal=I)

    out = pl.pallas_call(
        kernel,
        out_shape=jax.ShapeDtypeStruct((Bsz * Ssz, Esz), jnp.float32),
    )(x_cat, w_qkv, b_qkv, slab, vecs)
    return out.reshape(Bsz, Ssz, Esz)


# ---------------------------------------------------------------------------
# Pure-JAX reference (mirrors the PyTorch forward) for correctness check
# ---------------------------------------------------------------------------
def ref_decoder_block(mK, mQ, mV, p):
    Bsz, Ssz, Esz = mK.shape
    H, D = NHEAD, EMB_HEAD

    def linear(x, W, b):
        return jnp.einsum("...i,oi->...o", x, W) + b

    def ln(x, g, b, eps=EPS):
        m = x.mean(-1, keepdims=True)
        v = ((x - m) ** 2).mean(-1, keepdims=True)
        return (x - m) / jnp.sqrt(v + eps) * g + b

    key = mK.reshape(Bsz, Ssz, H, D)
    K_ = linear(key, p["Wk"], p["bk"]).transpose(0, 2, 1, 3)
    query = mQ.reshape(Bsz, Ssz, H, D)
    Q_ = linear(query, p["Wq"], p["bq"]).transpose(0, 2, 1, 3)
    value = mV.reshape(Bsz, Ssz, H, D)
    V_ = linear(value, p["Wv"], p["bv"]).transpose(0, 2, 1, 3)

    prod = jnp.einsum("bhqd,bhkd->bhqk", Q_, K_) / math.sqrt(D)
    scores = jax.nn.softmax(prod, axis=-1)
    ctx = jnp.einsum("bhqk,bhkd->bhqd", scores, V_)
    conc = ctx.transpose(0, 2, 1, 3).reshape(Bsz, Ssz, Esz)
    output = linear(conc, p["Wo"], p["bo"])
    attn = ln(output + mV, p["ga"], p["ba"])

    h1 = jax.nn.relu(ln(linear(attn, p["W1"], p["b1"]), p["gi1"], p["bi1"]))
    h2 = jax.nn.relu(ln(linear(h1, p["W2"], p["b2"]), p["gi2"], p["bi2"]))
    h3 = linear(h2, p["W3"], p["b3"])
    return ln(h3 + attn, p["gf"], p["bf"])


# ---------------------------------------------------------------------------
# Deterministic parameter init (shapes follow the module's __init__)
# ---------------------------------------------------------------------------
def init_params(key):
    D = EMB_HEAD
    keys = jax.random.split(key, 16)
    n = lambda k, shape, s=1.0: s * jax.random.normal(k, shape, jnp.float32)
    return {
        # AttentionLayer (Q/K/V/O weights init normal(0,1) like the module)
        "Wq": n(keys[0], (D, D)), "bq": n(keys[1], (D,), 0.1),
        "Wk": n(keys[2], (D, D)), "bk": n(keys[3], (D,), 0.1),
        "Wv": n(keys[4], (D, D)), "bv": n(keys[5], (D,), 0.1),
        "Wo": n(keys[6], (E, E)), "bo": n(keys[7], (E,), 0.1),
        "ga": jnp.ones((E,), jnp.float32), "ba": jnp.zeros((E,), jnp.float32),
        # FeedForward
        "W1": n(keys[8], (I, E), 1.0 / math.sqrt(E)), "b1": n(keys[9], (I,), 0.1),
        "gi1": jnp.ones((I,), jnp.float32), "bi1": jnp.zeros((I,), jnp.float32),
        "W2": n(keys[10], (I, I), 1.0 / math.sqrt(I)), "b2": n(keys[11], (I,), 0.1),
        "gi2": jnp.ones((I,), jnp.float32), "bi2": jnp.zeros((I,), jnp.float32),
        "W3": n(keys[12], (E, I), 1.0 / math.sqrt(I)), "b3": n(keys[13], (E,), 0.1),
        "gf": jnp.ones((E,), jnp.float32), "bf": jnp.zeros((E,), jnp.float32),
    }


if __name__ == "__main__":
    root = jax.random.PRNGKey(0)
    kp, kk, kq, kv = jax.random.split(root, 4)
    params = init_params(kp)

    mK = jax.random.normal(kk, (B, S, E), jnp.float32)
    mQ = jax.random.normal(kq, (B, S, E), jnp.float32)
    mV = jax.random.normal(kv, (B, S, E), jnp.float32)

    out = decoder_block(mK, mQ, mV, params)
    out = jax.block_until_ready(out)

    ref = jax.block_until_ready(ref_decoder_block(mK, mQ, mV, params))
    assert out.shape == (B, S, E)
    assert bool(jnp.all(jnp.isfinite(out)))
    # Tolerance sized for default (non-HIGHEST) MXU precision in the kernel vs
    # the plain-JAX reference; structural/layout bugs would be O(1) errors.
    assert bool(jnp.allclose(out, ref, rtol=5e-2, atol=5e-2)), (
        f"max abs diff {float(jnp.max(jnp.abs(out - ref)))}")

    print("KERNEL_OK")
</pallas_src>

<mosaic_0001>
module attributes {stable_mosaic.version = 11 : i64} {
  func.func @decoder_block_kernel(%arg0: memref<16x60xf32, #tpu.memory_space<vmem>>, %arg1: memref<60x60xf32, #tpu.memory_space<vmem>>, %arg2: memref<1x60xf32, #tpu.memory_space<vmem>>, %arg3: memref<4x32x32xf32, #tpu.memory_space<vmem>>, %arg4: memref<12x32xf32, #tpu.memory_space<vmem>>, %arg5: memref<16x20xf32, #tpu.memory_space<vmem>>) attributes {dimension_semantics = [], scalar_prefetch = 0 : i64, scratch_operands = 0 : i64, tpu.core_type = #tpu.core_type<tc>} {
    %c0 = arith.constant 0 : index
    %c0_0 = arith.constant 0 : index
    %0 = vector.load %arg0[%c0, %c0_0] : memref<16x60xf32, #tpu.memory_space<vmem>>, vector<16x60xf32>
    %1 = vector.extract_strided_slice %0 {offsets = [0, 40], sizes = [16, 20], strides = [1, 1]} : vector<16x60xf32> to vector<16x20xf32>
    %c0_1 = arith.constant 0 : index
    %c0_2 = arith.constant 0 : index
    %2 = vector.load %arg1[%c0_1, %c0_2] : memref<60x60xf32, #tpu.memory_space<vmem>>, vector<60x60xf32>
    %cst = arith.constant dense<0.000000e+00> : vector<16x60xf32>
    %3 = tpu.matmul %0, %2, %cst {dimension_numbers = #tpu.dot_dimension_numbers<[1], [0], [0], [1], [0, 0, 1, 1], [], []>} : vector<16x60xf32>, vector<60x60xf32>, vector<16x60xf32> -> vector<16x60xf32>
    %c0_3 = arith.constant 0 : index
    %c0_4 = arith.constant 0 : index
    %4 = vector.load %arg2[%c0_3, %c0_4] : memref<1x60xf32, #tpu.memory_space<vmem>>, vector<1x60xf32>
    %5 = vector.broadcast %4 : vector<1x60xf32> to vector<16x60xf32>
    %6 = arith.addf %3, %5 : vector<16x60xf32>
    %c0_5 = arith.constant 0 : index
    %c0_6 = arith.constant 0 : index
    %7 = vector.load %arg4[%c0_5, %c0_6] : memref<12x32xf32, #tpu.memory_space<vmem>>, vector<12x32xf32>
    %8 = vector.extract_strided_slice %6 {offsets = [0, 0], sizes = [8, 4], strides = [1, 1]} : vector<16x60xf32> to vector<8x4xf32>
    %9 = vector.extract_strided_slice %6 {offsets = [0, 20], sizes = [8, 4], strides = [1, 1]} : vector<16x60xf32> to vector<8x4xf32>
    %10 = vector.extract_strided_slice %6 {offsets = [0, 40], sizes = [8, 4], strides = [1, 1]} : vector<16x60xf32> to vector<8x4xf32>
    %cst_7 = arith.constant dense<0.000000e+00> : vector<8x8xf32>
    %11 = tpu.matmul %8, %9, %cst_7 {dimension_numbers = #tpu.dot_dimension_numbers<[1], [1], [0], [0], [0, 0, 1, 0], [], []>} : vector<8x4xf32>, vector<8x4xf32>, vector<8x8xf32> -> vector<8x8xf32>
    %cst_8 = arith.constant 5.000000e-01 : f32
    %12 = vector.broadcast %cst_8 : f32 to vector<8x8xf32>
    %13 = arith.mulf %11, %12 : vector<8x8xf32>
    %cst_9 = arith.constant dense<0xFF800000> : vector<8xf32>
    %14 = vector.multi_reduction <maximumf>, %13, %cst_9 [1] : vector<8x8xf32> to vector<8xf32>
    %15 = vector.shape_cast %14 : vector<8xf32> to vector<8x1xf32>
    %16 = vector.broadcast %15 : vector<8x1xf32> to vector<8x8xf32>
    %17 = arith.subf %13, %16 : vector<8x8xf32>
    %18 = math.exp %17 : vector<8x8xf32>
    %cst_10 = arith.constant dense<0.000000e+00> : vector<8xf32>
    %19 = vector.multi_reduction <add>, %18, %cst_10 [1] : vector<8x8xf32> to vector<8xf32>
    %20 = vector.shape_cast %19 : vector<8xf32> to vector<8x1xf32>
    %21 = tpu.reciprocal %20 {approx = true} : vector<8x1xf32> -> vector<8x1xf32>
    %22 = vector.broadcast %21 : vector<8x1xf32> to vector<8x8xf32>
    %23 = arith.mulf %18, %22 : vector<8x8xf32>
    %cst_11 = arith.constant dense<0.000000e+00> : vector<8x4xf32>
    %24 = tpu.matmul %23, %10, %cst_11 {dimension_numbers = #tpu.dot_dimension_numbers<[1], [0], [0], [1], [0, 0, 1, 1], [], []>} : vector<8x8xf32>, vector<8x4xf32>, vector<8x4xf32> -> vector<8x4xf32>
    %25 = vector.extract_strided_slice %6 {offsets = [0, 4], sizes = [8, 4], strides = [1, 1]} : vector<16x60xf32> to vector<8x4xf32>
    %26 = vector.extract_strided_slice %6 {offsets = [0, 24], sizes = [8, 4], strides = [1, 1]} : vector<16x60xf32> to vector<8x4xf32>
    %27 = vector.extract_strided_slice %6 {offsets = [0, 44], sizes = [8, 4], strides = [1, 1]} : vector<16x60xf32> to vector<8x4xf32>
    %cst_12 = arith.constant dense<0.000000e+00> : vector<8x8xf32>
    %28 = tpu.matmul %25, %26, %cst_12 {dimension_numbers = #tpu.dot_dimension_numbers<[1], [1], [0], [0], [0, 0, 1, 0], [], []>} : vector<8x4xf32>, vector<8x4xf32>, vector<8x8xf32> -> vector<8x8xf32>
    %cst_13 = arith.constant 5.000000e-01 : f32
    %29 = vector.broadcast %cst_13 : f32 to vector<8x8xf32>
    %30 = arith.mulf %28, %29 : vector<8x8xf32>
    %cst_14 = arith.constant dense<0xFF800000> : vector<8xf32>
    %31 = vector.multi_reduction <maximumf>, %30, %cst_14 [1] : vector<8x8xf32> to vector<8xf32>
    %32 = vector.shape_cast %31 : vector<8xf32> to vector<8x1xf32>
    %33 = vector.broadcast %32 : vector<8x1xf32> to vector<8x8xf32>
    %34 = arith.subf %30, %33 : vector<8x8xf32>
    %35 = math.exp %34 : vector<8x8xf32>
    %cst_15 = arith.constant dense<0.000000e+00> : vector<8xf32>
    %36 = vector.multi_reduction <add>, %35, %cst_15 [1] : vector<8x8xf32> to vector<8xf32>
    %37 = vector.shape_cast %36 : vector<8xf32> to vector<8x1xf32>
    %38 = tpu.reciprocal %37 {approx = true} : vector<8x1xf32> -> vector<8x1xf32>
    %39 = vector.broadcast %38 : vector<8x1xf32> to vector<8x8xf32>
    %40 = arith.mulf %35, %39 : vector<8x8xf32>
    %cst_16 = arith.constant dense<0.000000e+00> : vector<8x4xf32>
    %41 = tpu.matmul %40, %27, %cst_16 {dimension_numbers = #tpu.dot_dimension_numbers<[1], [0], [0], [1], [0, 0, 1, 1], [], []>} : vector<8x8xf32>, vector<8x4xf32>, vector<8x4xf32> -> vector<8x4xf32>
    %42 = vector.extract_strided_slice %6 {offsets = [0, 8], sizes = [8, 4], strides = [1, 1]} : vector<16x60xf32> to vector<8x4xf32>
    %43 = vector.extract_strided_slice %6 {offsets = [0, 28], sizes = [8, 4], strides = [1, 1]} : vector<16x60xf32> to vector<8x4xf32>
    %44 = vector.extract_strided_slice %6 {offsets = [0, 48], sizes = [8, 4], strides = [1, 1]} : vector<16x60xf32> to vector<8x4xf32>
    %cst_17 = arith.constant dense<0.000000e+00> : vector<8x8xf32>
    %45 = tpu.matmul %42, %43, %cst_17 {dimension_numbers = #tpu.dot_dimension_numbers<[1], [1], [0], [0], [0, 0, 1, 0], [], []>} : vector<8x4xf32>, vector<8x4xf32>, vector<8x8xf32> -> vector<8x8xf32>
    %cst_18 = arith.constant 5.000000e-01 : f32
    %46 = vector.broadcast %cst_18 : f32 to vector<8x8xf32>
    %47 = arith.mulf %45, %46 : vector<8x8xf32>
    %cst_19 = arith.constant dense<0xFF800000> : vector<8xf32>
    %48 = vector.multi_reduction <maximumf>, %47, %cst_19 [1] : vector<8x8xf32> to vector<8xf32>
    %49 = vector.shape_cast %48 : vector<8xf32> to vector<8x1xf32>
    %50 = vector.broadcast %49 : vector<8x1xf32> to vector<8x8xf32>
    %51 = arith.subf %47, %50 : vector<8x8xf32>
    %52 = math.exp %51 : vector<8x8xf32>
    %cst_20 = arith.constant dense<0.000000e+00> : vector<8xf32>
    %53 = vector.multi_reduction <add>, %52, %cst_20 [1] : vector<8x8xf32> to vector<8xf32>
    %54 = vector.shape_cast %53 : vector<8xf32> to vector<8x1xf32>
    %55 = tpu.reciprocal %54 {approx = true} : vector<8x1xf32> -> vector<8x1xf32>
    %56 = vector.broadcast %55 : vector<8x1xf32> to vector<8x8xf32>
    %57 = arith.mulf %52, %56 : vector<8x8xf32>
    %cst_21 = arith.constant dense<0.000000e+00> : vector<8x4xf32>
    %58 = tpu.matmul %57, %44, %cst_21 {dimension_numbers = #tpu.dot_dimension_numbers<[1], [0], [0], [1], [0, 0, 1, 1], [], []>} : vector<8x8xf32>, vector<8x4xf32>, vector<8x4xf32> -> vector<8x4xf32>
    %59 = vector.extract_strided_slice %6 {offsets = [0, 12], sizes = [8, 4], strides = [1, 1]} : vector<16x60xf32> to vector<8x4xf32>
    %60 = vector.extract_strided_slice %6 {offsets = [0, 32], sizes = [8, 4], strides = [1, 1]} : vector<16x60xf32> to vector<8x4xf32>
    %61 = vector.extract_strided_slice %6 {offsets = [0, 52], sizes = [8, 4], strides = [1, 1]} : vector<16x60xf32> to vector<8x4xf32>
    %cst_22 = arith.constant dense<0.000000e+00> : vector<8x8xf32>
    %62 = tpu.matmul %59, %60, %cst_22 {dimension_numbers = #tpu.dot_dimension_numbers<[1], [1], [0], [0], [0, 0, 1, 0], [], []>} : vector<8x4xf32>, vector<8x4xf32>, vector<8x8xf32> -> vector<8x8xf32>
    %cst_23 = arith.constant 5.000000e-01 : f32
    %63 = vector.broadcast %cst_23 : f32 to vector<8x8xf32>
    %64 = arith.mulf %62, %63 : vector<8x8xf32>
    %cst_24 = arith.constant dense<0xFF800000> : vector<8xf32>
    %65 = vector.multi_reduction <maximumf>, %64, %cst_24 [1] : vector<8x8xf32> to vector<8xf32>
    %66 = vector.shape_cast %65 : vector<8xf32> to vector<8x1xf32>
    %67 = vector.broadcast %66 : vector<8x1xf32> to vector<8x8xf32>
    %68 = arith.subf %64, %67 : vector<8x8xf32>
    %69 = math.exp %68 : vector<8x8xf32>
    %cst_25 = arith.constant dense<0.000000e+00> : vector<8xf32>
    %70 = vector.multi_reduction <add>, %69, %cst_25 [1] : vector<8x8xf32> to vector<8xf32>
    %71 = vector.shape_cast %70 : vector<8xf32> to vector<8x1xf32>
    %72 = tpu.reciprocal %71 {approx = true} : vector<8x1xf32> -> vector<8x1xf32>
    %73 = vector.broadcast %72 : vector<8x1xf32> to vector<8x8xf32>
    %74 = arith.mulf %69, %73 : vector<8x8xf32>
    %cst_26 = arith.constant dense<0.000000e+00> : vector<8x4xf32>
    %75 = tpu.matmul %74, %61, %cst_26 {dimension_numbers = #tpu.dot_dimension_numbers<[1], [0], [0], [1], [0, 0, 1, 1], [], []>} : vector<8x8xf32>, vector<8x4xf32>, vector<8x4xf32> -> vector<8x4xf32>
    %76 = vector.extract_strided_slice %6 {offsets = [0, 16], sizes = [8, 4], strides = [1, 1]} : vector<16x60xf32> to vector<8x4xf32>
    %77 = vector.extract_strided_slice %6 {offsets = [0, 36], sizes = [8, 4], strides = [1, 1]} : vector<16x60xf32> to vector<8x4xf32>
    %78 = vector.extract_strided_slice %6 {offsets = [0, 56], sizes = [8, 4], strides = [1, 1]} : vector<16x60xf32> to vector<8x4xf32>
    %cst_27 = arith.constant dense<0.000000e+00> : vector<8x8xf32>
    %79 = tpu.matmul %76, %77, %cst_27 {dimension_numbers = #tpu.dot_dimension_numbers<[1], [1], [0], [0], [0, 0, 1, 0], [], []>} : vector<8x4xf32>, vector<8x4xf32>, vector<8x8xf32> -> vector<8x8xf32>
    %cst_28 = arith.constant 5.000000e-01 : f32
    %80 = vector.broadcast %cst_28 : f32 to vector<8x8xf32>
    %81 = arith.mulf %79, %80 : vector<8x8xf32>
    %cst_29 = arith.constant dense<0xFF800000> : vector<8xf32>
    %82 = vector.multi_reduction <maximumf>, %81, %cst_29 [1] : vector<8x8xf32> to vector<8xf32>
    %83 = vector.shape_cast %82 : vector<8xf32> to vector<8x1xf32>
    %84 = vector.broadcast %83 : vector<8x1xf32> to vector<8x8xf32>
    %85 = arith.subf %81, %84 : vector<8x8xf32>
    %86 = math.exp %85 : vector<8x8xf32>
    %cst_30 = arith.constant dense<0.000000e+00> : vector<8xf32>
    %87 = vector.multi_reduction <add>, %86, %cst_30 [1] : vector<8x8xf32> to vector<8xf32>
    %88 = vector.shape_cast %87 : vector<8xf32> to vector<8x1xf32>
    %89 = tpu.reciprocal %88 {approx = true} : vector<8x1xf32> -> vector<8x1xf32>
    %90 = vector.broadcast %89 : vector<8x1xf32> to vector<8x8xf32>
    %91 = arith.mulf %86, %90 : vector<8x8xf32>
    %cst_31 = arith.constant dense<0.000000e+00> : vector<8x4xf32>
    %92 = tpu.matmul %91, %78, %cst_31 {dimension_numbers = #tpu.dot_dimension_numbers<[1], [0], [0], [1], [0, 0, 1, 1], [], []>} : vector<8x8xf32>, vector<8x4xf32>, vector<8x4xf32> -> vector<8x4xf32>
    %93 = tpu.concatenate %24, %41, %58, %75, %92 in 1 : vector<8x4xf32>, vector<8x4xf32>, vector<8x4xf32>, vector<8x4xf32>, vector<8x4xf32> -> vector<8x20xf32>
    %94 = vector.extract_strided_slice %6 {offsets = [8, 0], sizes = [8, 4], strides = [1, 1]} : vector<16x60xf32> to vector<8x4xf32>
    %95 = vector.extract_strided_slice %6 {offsets = [8, 20], sizes = [8, 4], strides = [1, 1]} : vector<16x60xf32> to vector<8x4xf32>
    %96 = vector.extract_strided_slice %6 {offsets = [8, 40], sizes = [8, 4], strides = [1, 1]} : vector<16x60xf32> to vector<8x4xf32>
    %cst_32 = arith.constant dense<0.000000e+00> : vector<8x8xf32>
    %97 = tpu.matmul %94, %95, %cst_32 {dimension_numbers = #tpu.dot_dimension_numbers<[1], [1], [0], [0], [0, 0, 1, 0], [], []>} : vector<8x4xf32>, vector<8x4xf32>, vector<8x8xf32> -> vector<8x8xf32>
    %cst_33 = arith.constant 5.000000e-01 : f32
    %98 = vector.broadcast %cst_33 : f32 to vector<8x8xf32>
    %99 = arith.mulf %97, %98 : vector<8x8xf32>
    %cst_34 = arith.constant dense<0xFF800000> : vector<8xf32>
    %100 = vector.multi_reduction <maximumf>, %99, %cst_34 [1] : vector<8x8xf32> to vector<8xf32>
    %101 = vector.shape_cast %100 : vector<8xf32> to vector<8x1xf32>
    %102 = vector.broadcast %101 : vector<8x1xf32> to vector<8x8xf32>
    %103 = arith.subf %99, %102 : vector<8x8xf32>
    %104 = math.exp %103 : vector<8x8xf32>
    %cst_35 = arith.constant dense<0.000000e+00> : vector<8xf32>
    %105 = vector.multi_reduction <add>, %104, %cst_35 [1] : vector<8x8xf32> to vector<8xf32>
    %106 = vector.shape_cast %105 : vector<8xf32> to vector<8x1xf32>
    %107 = tpu.reciprocal %106 {approx = true} : vector<8x1xf32> -> vector<8x1xf32>
    %108 = vector.broadcast %107 : vector<8x1xf32> to vector<8x8xf32>
    %109 = arith.mulf %104, %108 : vector<8x8xf32>
    %cst_36 = arith.constant dense<0.000000e+00> : vector<8x4xf32>
    %110 = tpu.matmul %109, %96, %cst_36 {dimension_numbers = #tpu.dot_dimension_numbers<[1], [0], [0], [1], [0, 0, 1, 1], [], []>} : vector<8x8xf32>, vector<8x4xf32>, vector<8x4xf32> -> vector<8x4xf32>
    %111 = vector.extract_strided_slice %6 {offsets = [8, 4], sizes = [8, 4], strides = [1, 1]} : vector<16x60xf32> to vector<8x4xf32>
    %112 = vector.extract_strided_slice %6 {offsets = [8, 24], sizes = [8, 4], strides = [1, 1]} : vector<16x60xf32> to vector<8x4xf32>
    %113 = vector.extract_strided_slice %6 {offsets = [8, 44], sizes = [8, 4], strides = [1, 1]} : vector<16x60xf32> to vector<8x4xf32>
    %cst_37 = arith.constant dense<0.000000e+00> : vector<8x8xf32>
    %114 = tpu.matmul %111, %112, %cst_37 {dimension_numbers = #tpu.dot_dimension_numbers<[1], [1], [0], [0], [0, 0, 1, 0], [], []>} : vector<8x4xf32>, vector<8x4xf32>, vector<8x8xf32> -> vector<8x8xf32>
    %cst_38 = arith.constant 5.000000e-01 : f32
    %115 = vector.broadcast %cst_38 : f32 to vector<8x8xf32>
    %116 = arith.mulf %114, %115 : vector<8x8xf32>
    %cst_39 = arith.constant dense<0xFF800000> : vector<8xf32>
    %117 = vector.multi_reduction <maximumf>, %116, %cst_39 [1] : vector<8x8xf32> to vector<8xf32>
    %118 = vector.shape_cast %117 : vector<8xf32> to vector<8x1xf32>
    %119 = vector.broadcast %118 : vector<8x1xf32> to vector<8x8xf32>
    %120 = arith.subf %116, %119 : vector<8x8xf32>
    %121 = math.exp %120 : vector<8x8xf32>
    %cst_40 = arith.constant dense<0.000000e+00> : vector<8xf32>
    %122 = vector.multi_reduction <add>, %121, %cst_40 [1] : vector<8x8xf32> to vector<8xf32>
    %123 = vector.shape_cast %122 : vector<8xf32> to vector<8x1xf32>
    %124 = tpu.reciprocal %123 {approx = true} : vector<8x1xf32> -> vector<8x1xf32>
    %125 = vector.broadcast %124 : vector<8x1xf32> to vector<8x8xf32>
    %126 = arith.mulf %121, %125 : vector<8x8xf32>
    %cst_41 = arith.constant dense<0.000000e+00> : vector<8x4xf32>
    %127 = tpu.matmul %126, %113, %cst_41 {dimension_numbers = #tpu.dot_dimension_numbers<[1], [0], [0], [1], [0, 0, 1, 1], [], []>} : vector<8x8xf32>, vector<8x4xf32>, vector<8x4xf32> -> vector<8x4xf32>
    %128 = vector.extract_strided_slice %6 {offsets = [8, 8], sizes = [8, 4], strides = [1, 1]} : vector<16x60xf32> to vector<8x4xf32>
    %129 = vector.extract_strided_slice %6 {offsets = [8, 28], sizes = [8, 4], strides = [1, 1]} : vector<16x60xf32> to vector<8x4xf32>
    %130 = vector.extract_strided_slice %6 {offsets = [8, 48], sizes = [8, 4], strides = [1, 1]} : vector<16x60xf32> to vector<8x4xf32>
    %cst_42 = arith.constant dense<0.000000e+00> : vector<8x8xf32>
    %131 = tpu.matmul %128, %129, %cst_42 {dimension_numbers = #tpu.dot_dimension_numbers<[1], [1], [0], [0], [0, 0, 1, 0], [], []>} : vector<8x4xf32>, vector<8x4xf32>, vector<8x8xf32> -> vector<8x8xf32>
    %cst_43 = arith.constant 5.000000e-01 : f32
    %132 = vector.broadcast %cst_43 : f32 to vector<8x8xf32>
    %133 = arith.mulf %131, %132 : vector<8x8xf32>
    %cst_44 = arith.constant dense<0xFF800000> : vector<8xf32>
    %134 = vector.multi_reduction <maximumf>, %133, %cst_44 [1] : vector<8x8xf32> to vector<8xf32>
    %135 = vector.shape_cast %134 : vector<8xf32> to vector<8x1xf32>
    %136 = vector.broadcast %135 : vector<8x1xf32> to vector<8x8xf32>
    %137 = arith.subf %133, %136 : vector<8x8xf32>
    %138 = math.exp %137 : vector<8x8xf32>
    %cst_45 = arith.constant dense<0.000000e+00> : vector<8xf32>
    %139 = vector.multi_reduction <add>, %138, %cst_45 [1] : vector<8x8xf32> to vector<8xf32>
    %140 = vector.shape_cast %139 : vector<8xf32> to vector<8x1xf32>
    %141 = tpu.reciprocal %140 {approx = true} : vector<8x1xf32> -> vector<8x1xf32>
    %142 = vector.broadcast %141 : vector<8x1xf32> to vector<8x8xf32>
    %143 = arith.mulf %138, %142 : vector<8x8xf32>
    %cst_46 = arith.constant dense<0.000000e+00> : vector<8x4xf32>
    %144 = tpu.matmul %143, %130, %cst_46 {dimension_numbers = #tpu.dot_dimension_numbers<[1], [0], [0], [1], [0, 0, 1, 1], [], []>} : vector<8x8xf32>, vector<8x4xf32>, vector<8x4xf32> -> vector<8x4xf32>
    %145 = vector.extract_strided_slice %6 {offsets = [8, 12], sizes = [8, 4], strides = [1, 1]} : vector<16x60xf32> to vector<8x4xf32>
    %146 = vector.extract_strided_slice %6 {offsets = [8, 32], sizes = [8, 4], strides = [1, 1]} : vector<16x60xf32> to vector<8x4xf32>
    %147 = vector.extract_strided_slice %6 {offsets = [8, 52], sizes = [8, 4], strides = [1, 1]} : vector<16x60xf32> to vector<8x4xf32>
    %cst_47 = arith.constant dense<0.000000e+00> : vector<8x8xf32>
    %148 = tpu.matmul %145, %146, %cst_47 {dimension_numbers = #tpu.dot_dimension_numbers<[1], [1], [0], [0], [0, 0, 1, 0], [], []>} : vector<8x4xf32>, vector<8x4xf32>, vector<8x8xf32> -> vector<8x8xf32>
    %cst_48 = arith.constant 5.000000e-01 : f32
    %149 = vector.broadcast %cst_48 : f32 to vector<8x8xf32>
    %150 = arith.mulf %148, %149 : vector<8x8xf32>
    %cst_49 = arith.constant dense<0xFF800000> : vector<8xf32>
    %151 = vector.multi_reduction <maximumf>, %150, %cst_49 [1] : vector<8x8xf32> to vector<8xf32>
    %152 = vector.shape_cast %151 : vector<8xf32> to vector<8x1xf32>
    %153 = vector.broadcast %152 : vector<8x1xf32> to vector<8x8xf32>
    %154 = arith.subf %150, %153 : vector<8x8xf32>
    %155 = math.exp %154 : vector<8x8xf32>
    %cst_50 = arith.constant dense<0.000000e+00> : vector<8xf32>
    %156 = vector.multi_reduction <add>, %155, %cst_50 [1] : vector<8x8xf32> to vector<8xf32>
    %157 = vector.shape_cast %156 : vector<8xf32> to vector<8x1xf32>
    %158 = tpu.reciprocal %157 {approx = true} : vector<8x1xf32> -> vector<8x1xf32>
    %159 = vector.broadcast %158 : vector<8x1xf32> to vector<8x8xf32>
    %160 = arith.mulf %155, %159 : vector<8x8xf32>
    %cst_51 = arith.constant dense<0.000000e+00> : vector<8x4xf32>
    %161 = tpu.matmul %160, %147, %cst_51 {dimension_numbers = #tpu.dot_dimension_numbers<[1], [0], [0], [1], [0, 0, 1, 1], [], []>} : vector<8x8xf32>, vector<8x4xf32>, vector<8x4xf32> -> vector<8x4xf32>
    %162 = vector.extract_strided_slice %6 {offsets = [8, 16], sizes = [8, 4], strides = [1, 1]} : vector<16x60xf32> to vector<8x4xf32>
    %163 = vector.extract_strided_slice %6 {offsets = [8, 36], sizes = [8, 4], strides = [1, 1]} : vector<16x60xf32> to vector<8x4xf32>
    %164 = vector.extract_strided_slice %6 {offsets = [8, 56], sizes = [8, 4], strides = [1, 1]} : vector<16x60xf32> to vector<8x4xf32>
    %cst_52 = arith.constant dense<0.000000e+00> : vector<8x8xf32>
    %165 = tpu.matmul %162, %163, %cst_52 {dimension_numbers = #tpu.dot_dimension_numbers<[1], [1], [0], [0], [0, 0, 1, 0], [], []>} : vector<8x4xf32>, vector<8x4xf32>, vector<8x8xf32> -> vector<8x8xf32>
    %cst_53 = arith.constant 5.000000e-01 : f32
    %166 = vector.broadcast %cst_53 : f32 to vector<8x8xf32>
    %167 = arith.mulf %165, %166 : vector<8x8xf32>
    %cst_54 = arith.constant dense<0xFF800000> : vector<8xf32>
    %168 = vector.multi_reduction <maximumf>, %167, %cst_54 [1] : vector<8x8xf32> to vector<8xf32>
    %169 = vector.shape_cast %168 : vector<8xf32> to vector<8x1xf32>
    %170 = vector.broadcast %169 : vector<8x1xf32> to vector<8x8xf32>
    %171 = arith.subf %167, %170 : vector<8x8xf32>
    %172 = math.exp %171 : vector<8x8xf32>
    %cst_55 = arith.constant dense<0.000000e+00> : vector<8xf32>
    %173 = vector.multi_reduction <add>, %172, %cst_55 [1] : vector<8x8xf32> to vector<8xf32>
    %174 = vector.shape_cast %173 : vector<8xf32> to vector<8x1xf32>
    %175 = tpu.reciprocal %174 {approx = true} : vector<8x1xf32> -> vector<8x1xf32>
    %176 = vector.broadcast %175 : vector<8x1xf32> to vector<8x8xf32>
    %177 = arith.mulf %172, %176 : vector<8x8xf32>
    %cst_56 = arith.constant dense<0.000000e+00> : vector<8x4xf32>
    %178 = tpu.matmul %177, %164, %cst_56 {dimension_numbers = #tpu.dot_dimension_numbers<[1], [0], [0], [1], [0, 0, 1, 1], [], []>} : vector<8x8xf32>, vector<8x4xf32>, vector<8x4xf32> -> vector<8x4xf32>
    %179 = tpu.concatenate %110, %127, %144, %161, %178 in 1 : vector<8x4xf32>, vector<8x4xf32>, vector<8x4xf32>, vector<8x4xf32>, vector<8x4xf32> -> vector<8x20xf32>
    %180 = tpu.concatenate %93, %179 in 0 : vector<8x20xf32>, vector<8x20xf32> -> vector<16x20xf32>
    %c3 = arith.constant 3 : index
    %c0_57 = arith.constant 0 : index
    %c0_58 = arith.constant 0 : index
    %181 = vector.load %arg3[%c3, %c0_57, %c0_58] : memref<4x32x32xf32, #tpu.memory_space<vmem>>, vector<1x32x32xf32>
    %182 = vector.shape_cast %181 : vector<1x32x32xf32> to vector<32x32xf32>
    %183 = vector.extract_strided_slice %182 {offsets = [0, 0], sizes = [20, 20], strides = [1, 1]} : vector<32x32xf32> to vector<20x20xf32>
    %cst_59 = arith.constant dense<0.000000e+00> : vector<16x20xf32>
    %184 = tpu.matmul %180, %183, %cst_59 {dimension_numbers = #tpu.dot_dimension_numbers<[1], [0], [0], [1], [0, 0, 1, 1], [], []>} : vector<16x20xf32>, vector<20x20xf32>, vector<16x20xf32> -> vector<16x20xf32>
    %185 = vector.extract_strided_slice %7 {offsets = [0, 0], sizes = [1, 20], strides = [1, 1]} : vector<12x32xf32> to vector<1x20xf32>
    %186 = vector.broadcast %185 : vector<1x20xf32> to vector<16x20xf32>
    %187 = arith.addf %184, %186 : vector<16x20xf32>
    %188 = arith.addf %187, %1 : vector<16x20xf32>
    %189 = vector.extract_strided_slice %7 {offsets = [1, 0], sizes = [1, 20], strides = [1, 1]} : vector<12x32xf32> to vector<1x20xf32>
    %190 = vector.extract_strided_slice %7 {offsets = [2, 0], sizes = [1, 20], strides = [1, 1]} : vector<12x32xf32> to vector<1x20xf32>
    %cst_60 = arith.constant dense<0.000000e+00> : vector<16xf32>
    %191 = vector.multi_reduction <add>, %188, %cst_60 [1] : vector<16x20xf32> to vector<16xf32>
    %192 = vector.shape_cast %191 : vector<16xf32> to vector<16x1xf32>
    %cst_61 = arith.constant 2.000000e+01 : f32
    %193 = vector.broadcast %cst_61 : f32 to vector<16x1xf32>
    %194 = arith.divf %192, %193 : vector<16x1xf32>
    %195 = vector.broadcast %194 : vector<16x1xf32> to vector<16x20xf32>
    %196 = arith.subf %188, %195 : vector<16x20xf32>
    %197 = arith.mulf %196, %196 : vector<16x20xf32>
    %cst_62 = arith.constant dense<0.000000e+00> : vector<16xf32>
    %198 = vector.multi_reduction <add>, %197, %cst_62 [1] : vector<16x20xf32> to vector<16xf32>
    %199 = vector.shape_cast %198 : vector<16xf32> to vector<16x1xf32>
    %cst_63 = arith.constant 2.000000e+01 : f32
    %200 = vector.broadcast %cst_63 : f32 to vector<16x1xf32>
    %201 = arith.divf %199, %200 : vector<16x1xf32>
    %202 = vector.broadcast %194 : vector<16x1xf32> to vector<16x20xf32>
    %203 = arith.subf %188, %202 : vector<16x20xf32>
    %cst_64 = arith.constant 9.99999974E-6 : f32
    %204 = vector.broadcast %cst_64 : f32 to vector<16x1xf32>
    %205 = arith.addf %201, %204 : vector<16x1xf32>
    %206 = math.rsqrt %205 : vector<16x1xf32>
    %207 = vector.broadcast %206 : vector<16x1xf32> to vector<16x20xf32>
    %208 = arith.mulf %203, %207 : vector<16x20xf32>
    %209 = vector.broadcast %189 : vector<1x20xf32> to vector<16x20xf32>
    %210 = arith.mulf %208, %209 : vector<16x20xf32>
    %211 = vector.broadcast %190 : vector<1x20xf32> to vector<16x20xf32>
    %212 = arith.addf %210, %211 : vector<16x20xf32>
    %c0_65 = arith.constant 0 : index
    %c0_66 = arith.constant 0 : index
    %c0_67 = arith.constant 0 : index
    %213 = vector.load %arg3[%c0_65, %c0_66, %c0_67] : memref<4x32x32xf32, #tpu.memory_space<vmem>>, vector<1x32x32xf32>
    %214 = vector.shape_cast %213 : vector<1x32x32xf32> to vector<32x32xf32>
    %215 = vector.extract_strided_slice %214 {offsets = [0, 0], sizes = [20, 32], strides = [1, 1]} : vector<32x32xf32> to vector<20x32xf32>
    %c1 = arith.constant 1 : index
    %c0_68 = arith.constant 0 : index
    %c0_69 = arith.constant 0 : index
    %216 = vector.load %arg3[%c1, %c0_68, %c0_69] : memref<4x32x32xf32, #tpu.memory_space<vmem>>, vector<1x32x32xf32>
    %217 = vector.shape_cast %216 : vector<1x32x32xf32> to vector<32x32xf32>
    %c2 = arith.constant 2 : index
    %c0_70 = arith.constant 0 : index
    %c0_71 = arith.constant 0 : index
    %218 = vector.load %arg3[%c2, %c0_70, %c0_71] : memref<4x32x32xf32, #tpu.memory_space<vmem>>, vector<1x32x32xf32>
    %219 = vector.shape_cast %218 : vector<1x32x32xf32> to vector<32x32xf32>
    %220 = vector.extract_strided_slice %219 {offsets = [0, 0], sizes = [32, 20], strides = [1, 1]} : vector<32x32xf32> to vector<32x20xf32>
    %cst_72 = arith.constant dense<0.000000e+00> : vector<16x32xf32>
    %221 = tpu.matmul %212, %215, %cst_72 {dimension_numbers = #tpu.dot_dimension_numbers<[1], [0], [0], [1], [0, 0, 1, 1], [], []>} : vector<16x20xf32>, vector<20x32xf32>, vector<16x32xf32> -> vector<16x32xf32>
    %222 = vector.extract_strided_slice %7 {offsets = [3, 0], sizes = [1, 32], strides = [1, 1]} : vector<12x32xf32> to vector<1x32xf32>
    %223 = vector.broadcast %222 : vector<1x32xf32> to vector<16x32xf32>
    %224 = arith.addf %221, %223 : vector<16x32xf32>
    %225 = vector.extract_strided_slice %7 {offsets = [4, 0], sizes = [1, 32], strides = [1, 1]} : vector<12x32xf32> to vector<1x32xf32>
    %226 = vector.extract_strided_slice %7 {offsets = [5, 0], sizes = [1, 32], strides = [1, 1]} : vector<12x32xf32> to vector<1x32xf32>
    %cst_73 = arith.constant dense<0.000000e+00> : vector<16xf32>
    %227 = vector.multi_reduction <add>, %224, %cst_73 [1] : vector<16x32xf32> to vector<16xf32>
    %228 = vector.shape_cast %227 : vector<16xf32> to vector<16x1xf32>
    %cst_74 = arith.constant 3.200000e+01 : f32
    %229 = vector.broadcast %cst_74 : f32 to vector<16x1xf32>
    %230 = arith.divf %228, %229 : vector<16x1xf32>
    %231 = vector.broadcast %230 : vector<16x1xf32> to vector<16x32xf32>
    %232 = arith.subf %224, %231 : vector<16x32xf32>
    %233 = arith.mulf %232, %232 : vector<16x32xf32>
    %cst_75 = arith.constant dense<0.000000e+00> : vector<16xf32>
    %234 = vector.multi_reduction <add>, %233, %cst_75 [1] : vector<16x32xf32> to vector<16xf32>
    %235 = vector.shape_cast %234 : vector<16xf32> to vector<16x1xf32>
    %cst_76 = arith.constant 3.200000e+01 : f32
    %236 = vector.broadcast %cst_76 : f32 to vector<16x1xf32>
    %237 = arith.divf %235, %236 : vector<16x1xf32>
    %238 = vector.broadcast %230 : vector<16x1xf32> to vector<16x32xf32>
    %239 = arith.subf %224, %238 : vector<16x32xf32>
    %cst_77 = arith.constant 9.99999974E-6 : f32
    %240 = vector.broadcast %cst_77 : f32 to vector<16x1xf32>
    %241 = arith.addf %237, %240 : vector<16x1xf32>
    %242 = math.rsqrt %241 : vector<16x1xf32>
    %243 = vector.broadcast %242 : vector<16x1xf32> to vector<16x32xf32>
    %244 = arith.mulf %239, %243 : vector<16x32xf32>
    %245 = vector.broadcast %225 : vector<1x32xf32> to vector<16x32xf32>
    %246 = arith.mulf %244, %245 : vector<16x32xf32>
    %247 = vector.broadcast %226 : vector<1x32xf32> to vector<16x32xf32>
    %248 = arith.addf %246, %247 : vector<16x32xf32>
    %cst_78 = arith.constant 0.000000e+00 : f32
    %249 = vector.broadcast %cst_78 : f32 to vector<16x32xf32>
    %250 = arith.maximumf %248, %249 : vector<16x32xf32>
    %cst_79 = arith.constant dense<0.000000e+00> : vector<16x32xf32>
    %251 = tpu.matmul %250, %217, %cst_79 {dimension_numbers = #tpu.dot_dimension_numbers<[1], [0], [0], [1], [0, 0, 1, 1], [], []>} : vector<16x32xf32>, vector<32x32xf32>, vector<16x32xf32> -> vector<16x32xf32>
    %252 = vector.extract_strided_slice %7 {offsets = [6, 0], sizes = [1, 32], strides = [1, 1]} : vector<12x32xf32> to vector<1x32xf32>
    %253 = vector.broadcast %252 : vector<1x32xf32> to vector<16x32xf32>
    %254 = arith.addf %251, %253 : vector<16x32xf32>
    %255 = vector.extract_strided_slice %7 {offsets = [7, 0], sizes = [1, 32], strides = [1, 1]} : vector<12x32xf32> to vector<1x32xf32>
    %256 = vector.extract_strided_slice %7 {offsets = [8, 0], sizes = [1, 32], strides = [1, 1]} : vector<12x32xf32> to vector<1x32xf32>
    %cst_80 = arith.constant dense<0.000000e+00> : vector<16xf32>
    %257 = vector.multi_reduction <add>, %254, %cst_80 [1] : vector<16x32xf32> to vector<16xf32>
    %258 = vector.shape_cast %257 : vector<16xf32> to vector<16x1xf32>
    %cst_81 = arith.constant 3.200000e+01 : f32
    %259 = vector.broadcast %cst_81 : f32 to vector<16x1xf32>
    %260 = arith.divf %258, %259 : vector<16x1xf32>
    %261 = vector.broadcast %260 : vector<16x1xf32> to vector<16x32xf32>
    %262 = arith.subf %254, %261 : vector<16x32xf32>
    %263 = arith.mulf %262, %262 : vector<16x32xf32>
    %cst_82 = arith.constant dense<0.000000e+00> : vector<16xf32>
    %264 = vector.multi_reduction <add>, %263, %cst_82 [1] : vector<16x32xf32> to vector<16xf32>
    %265 = vector.shape_cast %264 : vector<16xf32> to vector<16x1xf32>
    %cst_83 = arith.constant 3.200000e+01 : f32
    %266 = vector.broadcast %cst_83 : f32 to vector<16x1xf32>
    %267 = arith.divf %265, %266 : vector<16x1xf32>
    %268 = vector.broadcast %260 : vector<16x1xf32> to vector<16x32xf32>
    %269 = arith.subf %254, %268 : vector<16x32xf32>
    %cst_84 = arith.constant 9.99999974E-6 : f32
    %270 = vector.broadcast %cst_84 : f32 to vector<16x1xf32>
    %271 = arith.addf %267, %270 : vector<16x1xf32>
    %272 = math.rsqrt %271 : vector<16x1xf32>
    %273 = vector.broadcast %272 : vector<16x1xf32> to vector<16x32xf32>
    %274 = arith.mulf %269, %273 : vector<16x32xf32>
    %275 = vector.broadcast %255 : vector<1x32xf32> to vector<16x32xf32>
    %276 = arith.mulf %274, %275 : vector<16x32xf32>
    %277 = vector.broadcast %256 : vector<1x32xf32> to vector<16x32xf32>
    %278 = arith.addf %276, %277 : vector<16x32xf32>
    %cst_85 = arith.constant 0.000000e+00 : f32
    %279 = vector.broadcast %cst_85 : f32 to vector<16x32xf32>
    %280 = arith.maximumf %278, %279 : vector<16x32xf32>
    %cst_86 = arith.constant dense<0.000000e+00> : vector<16x20xf32>
    %281 = tpu.matmul %280, %220, %cst_86 {dimension_numbers = #tpu.dot_dimension_numbers<[1], [0], [0], [1], [0, 0, 1, 1], [], []>} : vector<16x32xf32>, vector<32x20xf32>, vector<16x20xf32> -> vector<16x20xf32>
    %282 = vector.extract_strided_slice %7 {offsets = [9, 0], sizes = [1, 20], strides = [1, 1]} : vector<12x32xf32> to vector<1x20xf32>
    %283 = vector.broadcast %282 : vector<1x20xf32> to vector<16x20xf32>
    %284 = arith.addf %281, %283 : vector<16x20xf32>
    %285 = arith.addf %284, %212 : vector<16x20xf32>
    %286 = vector.extract_strided_slice %7 {offsets = [10, 0], sizes = [1, 20], strides = [1, 1]} : vector<12x32xf32> to vector<1x20xf32>
    %287 = vector.extract_strided_slice %7 {offsets = [11, 0], sizes = [1, 20], strides = [1, 1]} : vector<12x32xf32> to vector<1x20xf32>
    %cst_87 = arith.constant dense<0.000000e+00> : vector<16xf32>
    %288 = vector.multi_reduction <add>, %285, %cst_87 [1] : vector<16x20xf32> to vector<16xf32>
    %289 = vector.shape_cast %288 : vector<16xf32> to vector<16x1xf32>
    %cst_88 = arith.constant 2.000000e+01 : f32
    %290 = vector.broadcast %cst_88 : f32 to vector<16x1xf32>
    %291 = arith.divf %289, %290 : vector<16x1xf32>
    %292 = vector.broadcast %291 : vector<16x1xf32> to vector<16x20xf32>
    %293 = arith.subf %285, %292 : vector<16x20xf32>
    %294 = arith.mulf %293, %293 : vector<16x20xf32>
    %cst_89 = arith.constant dense<0.000000e+00> : vector<16xf32>
    %295 = vector.multi_reduction <add>, %294, %cst_89 [1] : vector<16x20xf32> to vector<16xf32>
    %296 = vector.shape_cast %295 : vector<16xf32> to vector<16x1xf32>
    %cst_90 = arith.constant 2.000000e+01 : f32
    %297 = vector.broadcast %cst_90 : f32 to vector<16x1xf32>
    %298 = arith.divf %296, %297 : vector<16x1xf32>
    %299 = vector.broadcast %291 : vector<16x1xf32> to vector<16x20xf32>
    %300 = arith.subf %285, %299 : vector<16x20xf32>
    %cst_91 = arith.constant 9.99999974E-6 : f32
    %301 = vector.broadcast %cst_91 : f32 to vector<16x1xf32>
    %302 = arith.addf %298, %301 : vector<16x1xf32>
    %303 = math.rsqrt %302 : vector<16x1xf32>
    %304 = vector.broadcast %303 : vector<16x1xf32> to vector<16x20xf32>
    %305 = arith.mulf %300, %304 : vector<16x20xf32>
    %306 = vector.broadcast %286 : vector<1x20xf32> to vector<16x20xf32>
    %307 = arith.mulf %305, %306 : vector<16x20xf32>
    %308 = vector.broadcast %287 : vector<1x20xf32> to vector<16x20xf32>
    %309 = arith.addf %307, %308 : vector<16x20xf32>
    %c0_92 = arith.constant 0 : index
    %c0_93 = arith.constant 0 : index
    %310 = vector.load %arg5[%c0_92, %c0_93] : memref<16x20xf32, #tpu.memory_space<vmem>>, vector<16x20xf32>
    tpu.vector_store %arg5[%c0_92, %c0_93], %309 {strides = array<i32>} : memref<16x20xf32, #tpu.memory_space<vmem>>, vector<16x20xf32>,
    return
  }
}

</mosaic_0001>

<bundles_post_ra>
// kernel: tpu_custom_call.1
= control target key start
LH: loop header
LB: loop body
LE: loop exit
PB: predicated region body
PF: predicated region fallthrough
CT: control target
= control target key end

     0   :  { %10 = vsyncpa [#allocation3], 0  ;;  %s3404_s0 = inlined_call_operand.hbm [shape: f32[16,60], index: 0, kind: input, shape index: {}]   ;;  %s3405_s1 = inlined_call_operand.hbm [shape: f32[60,60], index: 1, kind: input, shape index: {}]   ;;  %s3406_s2 = inlined_call_operand.vmem [shape: f32[1,60], index: 2, kind: input, shape index: {}]   ;;  %s3407_s3 = inlined_call_operand.hbm [shape: f32[4,32,32], index: 3, kind: input, shape index: {}]   ;;  %s3408_s4 = inlined_call_operand.hbm [shape: f32[12,32], index: 4, kind: input, shape index: {}]   ;;  %s3409_s5 = inlined_call_operand.hbm [shape: f32[16,20], index: 5, kind: output, shape index: {}]  }
   0x1   :  { %11 = vsyncpa [#allocation6], 0 }
   0x2   :  { %12 = vsyncpa [#allocation9], 0 }
   0x3   :  { %13 = vsyncpa [#allocation4], 0  ;;  %s2955_s18 = smov [#allocation5]   ;;  %s2956_s20 = smov [#allocation2]  }
   0x4   :  { %s31_s19 = sshll.u32 %s2955_s18, 4  ;;  %s19_s21 = sshll.u32 %s2956_s20, 4  ;;  %s32_s19 = int_to_ptr.vmem [resolvable:$true] %s31_s19  ;;  %s3012_s21 = int_to_ptr.vmem [resolvable:$true] %s19_s21 }
   0x5   :  { %s2837_s24 = scalar_lea.hbm %s3405_s1, 1024 }
   0x6   :  { %p2838_p0 = scmp.ne.s32.totalorder %s3405_s1, %s2837_s24  ;;  %p2841_p1 = scmp.lt.u32.totalorder %s2837_s24, %s3405_s1 }
   0x8   :  { %p2843_p2 = pnand %p2841_p1, %p2838_p0 }
   0xa   :  { %2846 = shalt.err (!%p2843_p2)
}
   0xb   :  { %s2847_s29 = scalar_lea.vmem %s32_s19, 1024  ;;  %p2852_p4 = scmp.lt.s32.totalorder %s32_s19, %s32_s19 }
   0xc   :  { %p2848_p3 = scmp.ne.s32.totalorder %s32_s19, %s2847_s29  ;;  %p2853_p5 = scmp.lt.s32.totalorder %s2847_s29, %s2847_s29 }
   0xe   :  { %p2854_p6 = por %p2853_p5, %p2852_p4 }
  0x10   :  { %p2855_p7 = pnand %p2854_p6, %p2848_p3 }
  0x12   :  { %2858 = shalt.err (!%p2855_p7)
}
  0x13   :  { %s2957_s30 = smov 128   ;;  %s2958_s6 = smov 8  }
  0x14   :  { %37 = dma.hbm_to_vmem [thread:$0]  %s3405_s1, 1024, %s32_s19, [#allocation6], %s2957_s30, %s2957_s30, %s2958_s6  }
  0x15   :  { %s2859_s11 = scalar_lea.hbm %s3404_s0, 256 }
  0x16   :  { %p2860_p8 = scmp.ne.s32.totalorder %s3404_s0, %s2859_s11  ;;  %p2863_p9 = scmp.lt.u32.totalorder %s2859_s11, %s3404_s0 }
  0x18   :  { %p2865_p10 = pnand %p2863_p9, %p2860_p8 }
  0x1a   :  { %2868 = shalt.err (!%p2865_p10)
}
  0x1b   :  { %s2869_s16 = scalar_lea.vmem %s3012_s21, 256  ;;  %p2874_p12 = scmp.lt.s32.totalorder %s3012_s21, %s3012_s21 }
  0x1c   :  { %p2870_p11 = scmp.ne.s32.totalorder %s3012_s21, %s2869_s16  ;;  %p2875_p13 = scmp.lt.s32.totalorder %s2869_s16, %s2869_s16 }
  0x1e   :  { %p2876_p0 = por %p2875_p13, %p2874_p12 }
  0x20   :  { %p2877_p1 = pnand %p2876_p0, %p2870_p11 }
  0x22   :  { %2880 = shalt.err (!%p2877_p1)
}
  0x23   :  { %25 = dma.hbm_to_vmem [thread:$0]  %s3404_s0, 256, %s3012_s21, [#allocation3], %s2957_s30, %s2957_s30, %s2958_s6  }
  0x24   :  { %s2959_s18 = smov [#allocation7]   ;;  %s2960_s20 = smov [#allocation8]  }
  0x25   :  { %s45_s19 = sshll.u32 %s2959_s18, 4  ;;  %s57_s22 = sshll.u32 %s2960_s20, 4  ;;  %s46_s19 = int_to_ptr.vmem [resolvable:$true] %s45_s19  ;;  %s3049_s22 = int_to_ptr.vmem [resolvable:$true] %s57_s22 }
  0x26   :  { %s2881_s25 = scalar_lea.hbm %s3407_s3, 2048 }
  0x27   :  { %p2882_p2 = scmp.ne.s32.totalorder %s3407_s3, %s2881_s25  ;;  %p2885_p3 = scmp.lt.u32.totalorder %s2881_s25, %s3407_s3 }
  0x29   :  { %p2887_p4 = pnand %p2885_p3, %p2882_p2 }
  0x2b   :  { %2890 = shalt.err (!%p2887_p4)
}
  0x2c   :  { %s2891_s0 = scalar_lea.vmem %s46_s19, 2048  ;;  %p2896_p6 = scmp.lt.s32.totalorder %s46_s19, %s46_s19 }
  0x2d   :  { %p2892_p5 = scmp.ne.s32.totalorder %s46_s19, %s2891_s0  ;;  %p2897_p7 = scmp.lt.s32.totalorder %s2891_s0, %s2891_s0 }
  0x2f   :  { %p2898_p8 = por %p2897_p7, %p2896_p6 }
  0x31   :  { %p2899_p9 = pnand %p2898_p8, %p2892_p5 }
  0x33   :  { %2902 = shalt.err (!%p2899_p9)
}
  0x34   :  { %51 = dma.hbm_to_vmem [thread:$0]  %s3407_s3, 2048, %s46_s19, [#allocation6], %s2957_s30, %s2957_s30, %s2958_s6  }
  0x35   :  { %s2903_s10 = scalar_lea.hbm %s3408_s4, 256 }
  0x36   :  { %p2904_p10 = scmp.ne.s32.totalorder %s3408_s4, %s2903_s10  ;;  %p2907_p11 = scmp.lt.u32.totalorder %s2903_s10, %s3408_s4 }
  0x38   :  { %p2909_p12 = pnand %p2907_p11, %p2904_p10 }
  0x3a   :  { %2912 = shalt.err (!%p2909_p12)
}
  0x3b   :  { %s2913_s15 = scalar_lea.vmem %s3049_s22, 256  ;;  %p2918_p0 = scmp.lt.s32.totalorder %s3049_s22, %s3049_s22 }
  0x3c   :  { %p2914_p13 = scmp.ne.s32.totalorder %s3049_s22, %s2913_s15  ;;  %p2919_p1 = scmp.lt.s32.totalorder %s2913_s15, %s2913_s15 }
  0x3e   :  { %p2920_p2 = por %p2919_p1, %p2918_p0 }
  0x40   :  { %p2921_p3 = pnand %p2920_p2, %p2914_p13 }
  0x42   :  { %2924 = shalt.err (!%p2921_p3)
}
  0x43   :  { %63 = dma.hbm_to_vmem [thread:$0]  %s3408_s4, 256, %s3049_s22, [#allocation9], %s2957_s30, %s2957_s30, %s2958_s6  }
  0x44   :  { %2947 = dma.done.wait [#allocation3], 256  }
  0x45   :  { %2948 = vsyncadd [#allocation3], 4294967040 }
  0x46   :  { %2949 = dma.done.wait [#allocation6], 3072  }
  0x47   :  { %2950 = vsyncadd [#allocation6], 4294964224 }
  0x48   :  { %2951 = dma.done.wait [#allocation9], 256  }
  0x49   :  { %2952 = vsyncadd [#allocation9], 4294967040  ;;  %v78_v0 = vld [vmem:[#allocation5] sm:$0xff]  ;;  %v79_v1 = vld [vmem:[#allocation5 + $0x8] sm:$0xff]  ;;  %vm93_vm0 = vcmask 490496   ;;  %vm100_vm1 = vcmask 1043456  }
  0x4a   :  { %v80_v2 = vld [vmem:[#allocation5 + $0x10] sm:$0xff]  ;;  %v2712_v3 = vpack.c.bf16 %v79_v1, %v78_v0  ;;  %v81_v4 = vld [vmem:[#allocation5 + $0x18] sm:$0xff]  ;;  %v82_v6 = vld [vmem:[#allocation5 + $0x20] sm:$0xff]  ;;  %vm2961_vm2 = vmmov 1   ;;  %v2962_v14 = vmov 0.0   ;;  %vm2963_vm4 = vmmov 0  }
  0x4b   :  { %v2716_v5 = vpack.c.bf16 %v81_v4, %v80_v2  ;;  %v83_v7 = vld [vmem:[#allocation5 + $0x28] sm:$0xff]  ;;  %v3086_v8 = vld [vmem:[#allocation2] sm:$0xff]  ;;  %v85_v11 = vld [vmem:[#allocation5 + $0x38] sm:$0xf]  ;;  %2572 = vmatprep.subr.mxu1 %v2962_v14  ;;  %2574 = vmatprep.mubr.msk.f32.mxu1 %vm2963_vm4, %v2962_v14  ;;  %s2964_s17 = smov 88   ;;  %s2965_s18 = smov 108  }
  0x4c   :  { %2713 = vmatprep.subr.bf16.mxu0 %v2712_v3  ;;  %2569 = vmatprep.mubr.msk.f32.mxu0 %vm93_vm0, %v3086_v8  ;;  %v2720_v9 = vpack.c.bf16 %v83_v7, %v82_v6  ;;  %v84_v10 = vld [vmem:[#allocation5 + $0x30] sm:$0xff]  ;;  %vm2725_vm3 = vmpackc.low %vm100_vm1, %vm2961_vm2  ;;  %v3091_v13 = vld [vmem:[#allocation2 + $0x8] sm:$0xff]  ;;  %s2966_s19 = smov 104   ;;  %s2967_s20 = smov 124   ;;  %vm184_vm5 = vcmask 31744   ;;  %vm260_vm6 = vcmask 64512  }
  0x4d   :  { %2715 = vmatpush3.bf16.msra.mxu0 %v2712_v3  ;;  %v2724_v12 = vpack.c.bf16 %v85_v11, %v84_v10  ;;  %v2437_v15 = vld [vmem:[%s3406_s2] ss:$0 sm:$0xff]  ;;  %s2968_s2 = smov 100   ;;  %s2969_s22 = smov 120   ;;  %vm1030_vm7 = vcmask 97280   ;;  %vm1032_vm8 = vcmask 130048  }
  0x4e   :  { %2717 = vmatprep.subr.bf16.mxu0 %v2716_v5  ;;  %s2970_s23 = smov 116   ;;  %s2971_s24 = smov 96   ;;  %vm1891_vm9 = vcmask 162816   ;;  %vm2124_vm10 = vcmask 261120  }
  0x4f   :  { %s2972_s25 = smov 112   ;;  %s2973_s26 = smov 92  }
  0x50   :  { %s2974_s27 = smov 80   ;;  %s2975_s28 = smov 84  }
  0x51   :  { %2719 = vmatpush3.bf16.msra.mxu0 %v2716_v5  ;;  %s2976_s29 = smov 76   ;;  %s2977_s0 = smov 72  }
  0x52   :  { %2721 = vmatprep.subr.bf16.mxu0 %v2720_v9  ;;  %s2978_s21 = smov 4   ;;  %s2979_s7 = smov 12  }
  0x53   :  { %s2980_s8 = smov 16   ;;  %s2981_s9 = smov [#allocation10]  }
  0x54   :  { %s2423_s10 = sshll.u32 %s2981_s9, 4  ;;  %s2424_s10 = int_to_ptr.vmem [resolvable:$true] %s2423_s10 }
  0x55   :  { %2723 = vmatpush3.bf16.msra.mxu0 %v2720_v9  ;;  %s2925_s11 = scalar_lea.vmem %s2424_s10, 256  ;;  %p2930_p5 = scmp.lt.s32.totalorder %s2424_s10, %s2424_s10 }
  0x56   :  { %2726 = vmatprep.subr.msk.bf16.mxu0 %vm2725_vm3, %v2724_v12  ;;  %p2926_p4 = scmp.ne.s32.totalorder %s2424_s10, %s2925_s11  ;;  %p2931_p6 = scmp.lt.s32.totalorder %s2925_s11, %s2925_s11 }
  0x58   :  { %p2932_p7 = por %p2931_p6, %p2930_p5 }
  0x59   :  { %2729 = vmatpush3.bf16.msk.msra.mxu0 %vm2725_vm3, %v2724_v12 }
  0x5a   :  { %2592 = vmatprep.subr.mxu0 %v2962_v14  ;;  %p2933_p8 = pnand %p2932_p7, %p2926_p4 }
  0x5c   :  { %2570 = vmatmul.mubr.msk.f32.vlgmr.msra.gmra.mrb[0].mxu0 %vm93_vm0, %v3091_v13 }
  0x5d   :  { %2594 = vmatprep.mubr.msk.f32.mxu0 %vm2963_vm4, %v2962_v14 }
 0x12f   :  { %v2571_v16 = vpop.f32.mrb[0].mxu0 }
 0x130   :  { %v3104_v17 = vadd.f32 %v2571_v16, %v2437_v15  ;;  %v170_v18 = vpop.f32.mrb[1].mxu0 }
 0x131   :  { %v3106_v19 = vadd.f32 %v2437_v15, %v170_v18 }
 0x133   :  { %272 = vrot.lane.b32.xlu1 %v3106_v19, %s2964_s17  ;;  %182 = vrot.lane.b32.xlu0 %v3106_v19, %s2965_s18 }
 0x137   :  { %350 = vrot.lane.b32.xlu1 %v3106_v19, %s2966_s19 }
 0x13b   :  { %348 = vrot.lane.b32.xlu1 %v3106_v19, %s2967_s20 }
 0x13f   :  { %516 = vrot.lane.b32.xlu1 %v3106_v19, %s2968_s2 }
 0x143   :  { %514 = vrot.lane.b32.xlu1 %v3106_v19, %s2969_s22 }
 0x147   :  { %680 = vrot.lane.b32.xlu1 %v3106_v19, %s2970_s23 }
 0x1a5   :  { %v273_v20 = vpop.permute.xlu1 %272  ;;  %v183_v21 = vpop.permute.xlu0 %182 }
 0x1a6   :  { %2573 = vmatpush3.xpose.msk.msra.mxu1 %vm184_vm5, %v183_v21 }
 0x1a7   :  { %2577 = vmatprep.subr.mxu1 %v2962_v14 }
 0x1a9   :  { %v3124_v22 = vpop.permute.xlu1 %350  ;;  %2575 = vmatmul.mubr.msk.f32.vlgmr.msra.gmra.mrb[0].mxu1 %vm184_vm5, %v3106_v19 }
 0x1aa   :  { %2578 = vmatpush3.msra.mxu1 %v273_v20  ;;  %2579 = vmatprep.mubr.msk.f32.mxu1 %vm2963_vm4, %v2962_v14 }
 0x1ab   :  { %2582 = vmatprep.subr.mxu1 %v2962_v14 }
 0x1ad   :  { %v3131_v23 = vpop.permute.xlu1 %348 }
 0x1b1   :  { %v517_v24 = vpop.permute.xlu1 %516 }
 0x1b2   :  { %2593 = vmatpush3.xpose.msk.msra.mxu0 %vm184_vm5, %v517_v24 }
 0x1b3   :  { %2602 = vmatprep.subr.mxu0 %v2962_v14 }
 0x1b5   :  { %v515_v25 = vpop.permute.xlu1 %514 }
 0x1b6   :  { %2595 = vmatmul.mubr.msk.f32.vlgmr.msra.gmra.mrb[2].mxu0 %vm184_vm5, %v515_v25 }
 0x1b7   :  { %2604 = vmatprep.mubr.msk.f32.mxu0 %vm2963_vm4, %v2962_v14 }
 0x1b9   :  { %v681_v38 = vpop.permute.xlu1 %680 }
 0x27c   :  { %v255_v26 = vpop.f32.mrb[0].mxu1 }
 0x27d   :  { %v259_v27 = vmul.f32 0.5, %v255_v26  ;;  %v2576_v28 = vpop.f32.mrb[1].mxu1 }
 0x27f   :  { %v261_v29 = vsel %vm260_vm6, %v259_v27, -inf }
 0x280   :  { %262 = vmax.xlane.f32.xlu0 %v261_v29 }
 0x289   :  { %v588_v30 = vpop.f32.mrb[2].mxu0 }
 0x28a   :  { %v2596_v31 = vpop.f32.mrb[3].mxu0  ;;  %v3147_v32 = vmul.f32 0.5, %v588_v30 }
 0x28c   :  { %v593_v33 = vsel %vm260_vm6, %v3147_v32, -inf }
 0x296   :  { %682 = vrot.lane.b32.xlu0 %v3106_v19, %s2971_s24 }
 0x29a   :  { %1199 = vrot.lane.b32.xlu0 %v3104_v17, %s2967_s20 }
 0x29e   :  { %1365 = vrot.lane.b32.xlu0 %v3104_v17, %s2969_s22 }
 0x2a2   :  { %1531 = vrot.lane.b32.xlu0 %v3104_v17, %s2970_s23 }
 0x2a6   :  { %1697 = vrot.lane.b32.xlu0 %v3104_v17, %s2972_s25 }
 0x2c5   :  { %594 = vmax.xlane.f32.xlu0 %v593_v33 }
 0x30d   :  { %v263_v34 = vpop.xlane.xlu0 %262 }
 0x30e   :  { %v264_v35 = vsub.f32 %v259_v27, %v263_v34 }
 0x310   :  { %v265_v36 = vmul.f32 1.442695, %v264_v35 }
 0x311   :  { %v683_v37 = vpop.permute.xlu0 %682 }
 0x312   :  { %2781 = vpow2.f32 %v265_v36  ;;  %2603 = vmatpush3.xpose.msk.msra.mxu0 %vm184_vm5, %v683_v37 }
 0x313   :  { %2612 = vmatprep.subr.mxu0 %v2962_v14 }
 0x315   :  { %2605 = vmatmul.mubr.msk.f32.vlgmr.msra.gmra.mrb[4].mxu0 %vm184_vm5, %v681_v38  ;;  %v1200_v47 = vpop.permute.xlu0 %1199 }
 0x316   :  { %2614 = vmatprep.mubr.msk.f32.mxu0 %vm2963_vm4, %v2962_v14 }
 0x319   :  { %v1366_v49 = vpop.permute.xlu0 %1365 }
 0x31c   :  { %v2782_v39 = vpop.eup %2781 }
 0x31d   :  { %v267_v40 = vsel %vm260_vm6, %v2782_v39, 0.0  ;;  %v1532_v52 = vpop.permute.xlu0 %1531 }
 0x31e   :  { %268 = vadd.xlane.f32.xlu1 %v267_v40 }
 0x321   :  { %v1698_v54 = vpop.permute.xlu0 %1697 }
 0x32f   :  { %848 = vrot.lane.b32.xlu1 %v3106_v19, %s2973_s26 }
 0x333   :  { %846 = vrot.lane.b32.xlu1 %v3106_v19, %s2972_s25 }
 0x337   :  { %1035 = vrot.lane.b32.xlu1 %v3104_v17, %s2965_s18 }
 0x33b   :  { %1201 = vrot.lane.b32.xlu1 %v3104_v17, %s2966_s19 }
 0x33f   :  { %1367 = vrot.lane.b32.xlu1 %v3104_v17, %s2968_s2 }
 0x343   :  { %1533 = vrot.lane.b32.xlu1 %v3104_v17, %s2971_s24 }
 0x347   :  { %1699 = vrot.lane.b32.xlu1 %v3104_v17, %s2973_s26 }
 0x352   :  { %v595_v59 = vpop.xlane.xlu0 %594 }
 0x353   :  { %v596_v5 = vsub.f32 %v3147_v32, %v595_v59 }
 0x355   :  { %v597_v20 = vmul.f32 1.442695, %v596_v5 }
 0x3ab   :  { %v269_v41 = vpop.xlane.xlu1 %268 }
 0x3ac   :  { %2783 = vrcp.f32 %v269_v41 }
 0x3af   :  { %v849_v42 = vpop.permute.xlu1 %848 }
 0x3b0   :  { %2613 = vmatpush3.xpose.msk.msra.mxu0 %vm184_vm5, %v849_v42 }
 0x3b1   :  { %2622 = vmatprep.subr.mxu0 %v2962_v14 }
 0x3b3   :  { %v847_v43 = vpop.permute.xlu1 %846 }
 0x3b4   :  { %2615 = vmatmul.mubr.msk.f32.vlgmr.msra.gmra.mrb[6].mxu0 %vm184_vm5, %v847_v43 }
 0x3b5   :  { %2624 = vmatprep.mubr.msk.f32.mxu0 %vm2963_vm4, %v2962_v14 }
 0x3b6   :  { %v2784_v44 = vpop.eup %2783 }
 0x3b7   :  { %v271_v45 = vmul.f32 %v2784_v44, %v2782_v39  ;;  %v1036_v46 = vpop.permute.xlu1 %1035 }
 0x3b8   :  { %2623 = vmatpush3.xpose.msk.msra.mxu0 %vm184_vm5, %v1036_v46 }
 0x3b9   :  { %2580 = vmatmul.mubr.msk.f32.vlgmr.msra.gmra.mrb[2].mxu1 %vm260_vm6, %v271_v45  ;;  %2632 = vmatprep.subr.mxu0 %v2962_v14 }
 0x3ba   :  { %2583 = vmatpush3.xpose.msk.msra.mxu1 %vm184_vm5, %v3124_v22  ;;  %2584 = vmatprep.mubr.msk.f32.mxu1 %vm2963_vm4, %v2962_v14 }
 0x3bb   :  { %v1202_v48 = vpop.permute.xlu1 %1201  ;;  %2625 = vmatmul.mubr.msk.f32.vlgmr.msra.gmra.mrb[8].mxu0 %vm184_vm5, %v3104_v17  ;;  %2587 = vmatprep.subr.mxu1 %v2962_v14 }
 0x3bc   :  { %2633 = vmatpush3.xpose.msk.msra.mxu0 %vm184_vm5, %v1202_v48  ;;  %2634 = vmatprep.mubr.msk.f32.mxu0 %vm2963_vm4, %v2962_v14 }
 0x3bd   :  { %2585 = vmatmul.mubr.msk.f32.vlgmr.msra.gmra.mrb[4].mxu1 %vm184_vm5, %v3131_v23  ;;  %2642 = vmatprep.subr.mxu0 %v2962_v14 }
 0x3be   :  { %2589 = vmatprep.mubr.msk.f32.mxu1 %vm2963_vm4, %v2962_v14 }
 0x3bf   :  { %v1368_v50 = vpop.permute.xlu1 %1367  ;;  %2635 = vmatmul.mubr.msk.f32.vlgmr.msra.gmra.mrb[10].mxu0 %vm184_vm5, %v1200_v47 }
 0x3c0   :  { %2643 = vmatpush3.xpose.msk.msra.mxu0 %vm184_vm5, %v1368_v50  ;;  %2644 = vmatprep.mubr.msk.f32.mxu0 %vm2963_vm4, %v2962_v14 }
 0x3c1   :  { %2652 = vmatprep.subr.mxu0 %v2962_v14 }
 0x3c3   :  { %v1534_v51 = vpop.permute.xlu1 %1533  ;;  %2645 = vmatmul.mubr.msk.f32.vlgmr.msra.gmra.mrb[12].mxu0 %vm184_vm5, %v1366_v49 }
 0x3c4   :  { %2653 = vmatpush3.xpose.msk.msra.mxu0 %vm184_vm5, %v1534_v51  ;;  %2654 = vmatprep.mubr.msk.f32.mxu0 %vm2963_vm4, %v2962_v14 }
 0x3c5   :  { %2662 = vmatprep.subr.mxu0 %v2962_v14 }
 0x3c7   :  { %v1700_v53 = vpop.permute.xlu1 %1699  ;;  %2655 = vmatmul.mubr.msk.f32.vlgmr.msra.gmra.mrb[14].mxu0 %vm184_vm5, %v1532_v52 }
 0x3c8   :  { %2663 = vmatpush3.xpose.msk.msra.mxu0 %vm184_vm5, %v1700_v53  ;;  %2664 = vmatprep.mubr.msk.f32.mxu0 %vm2963_vm4, %v2962_v14 }
 0x3cb   :  { %2665 = vmatmul.mubr.msk.f32.vlgmr.msra.gmra.mrb[16].mxu0 %vm184_vm5, %v1698_v54 }
 0x3e8   :  { %v754_v55 = vpop.f32.mrb[4].mxu0 }
 0x3e9   :  { %v758_v56 = vmul.f32 0.5, %v754_v55  ;;  %v2606_v57 = vpop.f32.mrb[5].mxu0 }
 0x3eb   :  { %v759_v58 = vsel %vm260_vm6, %v758_v56, -inf }
 0x3ec   :  { %760 = vmax.xlane.f32.xlu0 %v759_v58 }
 0x479   :  { %v761_v62 = vpop.xlane.xlu0 %760 }
 0x47a   :  { %v762_v1 = vsub.f32 %v758_v56, %v761_v62 }
 0x47c   :  { %v763_v11 = vmul.f32 1.442695, %v762_v1 }
 0x47e   :  { %2785 = vpow2.f32 %v763_v11 }
 0x47f   :  { %2787 = vpow2.f32 %v597_v20 }
 0x487   :  { %v920_v60 = vpop.f32.mrb[6].mxu0 }
 0x488   :  { %v2616_v61 = vpop.f32.mrb[7].mxu0  ;;  %v924_v15 = vmul.f32 0.5, %v920_v60  ;;  %v3218_v35 = vpop.eup %2785 }
 0x489   :  { %v3221_v37 = vpop.eup %2787  ;;  %v765_v38 = vsel %vm260_vm6, %v3218_v35, 0.0 }
 0x48a   :  { %v925_v25 = vsel %vm260_vm6, %v924_v15, -inf  ;;  %v599_v39 = vsel %vm260_vm6, %v3221_v37, 0.0 }
 0x48c   :  { %v3206_v63 = vpop.f32.mrb[2].mxu1 }
 0x48d   :  { %v2581_v0 = vpop.f32.mrb[3].mxu1 }
 0x48e   :  { %v1107_v2 = vpop.f32.mrb[8].mxu0 }
 0x48f   :  { %v1111_v3 = vmul.f32 0.5, %v1107_v2  ;;  %v2626_v4 = vpop.f32.mrb[9].mxu0 }
 0x490   :  { %v422_v6 = vpop.f32.mrb[4].mxu1 }
 0x491   :  { %v3209_v7 = vmul.f32 0.5, %v422_v6  ;;  %v2586_v9 = vpop.f32.mrb[5].mxu1  ;;  %v1112_v10 = vsel %vm260_vm6, %v1111_v3, -inf }
 0x492   :  { %1113 = vmax.xlane.f32.xlu0 %v1112_v10  ;;  %v1273_v12 = vpop.f32.mrb[10].mxu0 }
 0x493   :  { %v2636_v16 = vpop.f32.mrb[11].mxu0  ;;  %v427_v18 = vsel %vm260_vm6, %v3209_v7, -inf  ;;  %v1277_v22 = vmul.f32 0.5, %v1273_v12 }
 0x494   :  { %428 = vmax.xlane.f32.xlu1 %v427_v18 }
 0x495   :  { %v1278_v30 = vsel %vm260_vm6, %v1277_v22, -inf }
 0x496   :  { %v1439_v21 = vpop.f32.mrb[12].mxu0 }
 0x497   :  { %v1443_v23 = vmul.f32 0.5, %v1439_v21  ;;  %v2646_v24 = vpop.f32.mrb[13].mxu0 }
 0x498   :  { %926 = vmax.xlane.f32.xlu1 %v925_v25 }
 0x499   :  { %v1444_v26 = vsel %vm260_vm6, %v1443_v23, -inf }
 0x49a   :  { %1445 = vmax.xlane.f32.xlu0 %v1444_v26  ;;  %v1605_v27 = vpop.f32.mrb[14].mxu0 }
 0x49b   :  { %v1609_v28 = vmul.f32 0.5, %v1605_v27  ;;  %v2656_v29 = vpop.f32.mrb[15].mxu0 }
 0x49c   :  { %1279 = vmax.xlane.f32.xlu1 %v1278_v30 }
 0x49d   :  { %v1610_v34 = vsel %vm260_vm6, %v1609_v28, -inf }
 0x49e   :  { %v1771_v31 = vpop.f32.mrb[16].mxu0 }
 0x49f   :  { %v1775_v32 = vmul.f32 0.5, %v1771_v31  ;;  %v2666_v33 = vpop.f32.mrb[17].mxu0 }
 0x4a0   :  { %1611 = vmax.xlane.f32.xlu1 %v1610_v34 }
 0x4a1   :  { %v1776_v36 = vsel %vm260_vm6, %v1775_v32, -inf }
 0x4a2   :  { %1777 = vmax.xlane.f32.xlu0 %v1776_v36 }
 0x4a4   :  { %766 = vadd.xlane.f32.xlu1 %v765_v38 }
 0x4a6   :  { %600 = vadd.xlane.f32.xlu0 %v599_v39 }
 0x51f   :  { %v1114_v40 = vpop.xlane.xlu0 %1113 }
 0x520   :  { %v1115_v41 = vsub.f32 %v1111_v3, %v1114_v40 }
 0x521   :  { %v429_v42 = vpop.xlane.xlu1 %428 }
 0x522   :  { %v1116_v43 = vmul.f32 1.442695, %v1115_v41  ;;  %v430_v5 = vsub.f32 %v3209_v7, %v429_v42 }
 0x524   :  { %2789 = vpow2.f32 %v1116_v43  ;;  %v431_v9 = vmul.f32 1.442695, %v430_v5 }
 0x525   :  { %v927_v44 = vpop.xlane.xlu1 %926 }
 0x526   :  { %v928_v45 = vsub.f32 %v924_v15, %v927_v44 }
 0x527   :  { %v1446_v46 = vpop.xlane.xlu0 %1445 }
 0x528   :  { %v929_v47 = vmul.f32 1.442695, %v928_v45  ;;  %v1447_v48 = vsub.f32 %v1443_v23, %v1446_v46 }
 0x529   :  { %v1280_v49 = vpop.xlane.xlu1 %1279 }
 0x52a   :  { %2791 = vpow2.f32 %v929_v47  ;;  %v1448_v50 = vmul.f32 1.442695, %v1447_v48  ;;  %v1281_v51 = vsub.f32 %v1277_v22, %v1280_v49 }
 0x52c   :  { %2793 = vpow2.f32 %v1448_v50  ;;  %v1282_v52 = vmul.f32 1.442695, %v1281_v51 }
 0x52d   :  { %v1612_v53 = vpop.xlane.xlu1 %1611 }
 0x52e   :  { %v3227_v54 = vpop.eup %2789  ;;  %2795 = vpow2.f32 %v1282_v52  ;;  %v1613_v55 = vsub.f32 %v1609_v28, %v1612_v53 }
 0x52f   :  { %v1118_v56 = vsel %vm260_vm6, %v3227_v54, 0.0  ;;  %v1778_v3 = vpop.xlane.xlu0 %1777 }
 0x530   :  { %v1614_v57 = vmul.f32 1.442695, %v1613_v55  ;;  %1119 = vadd.xlane.f32.xlu1 %v1118_v56  ;;  %v1779_v4 = vsub.f32 %v1775_v32, %v1778_v3 }
 0x531   :  { %v767_v21 = vpop.xlane.xlu1 %766 }
 0x532   :  { %2797 = vpow2.f32 %v1614_v57  ;;  %v1780_v6 = vmul.f32 1.442695, %v1779_v4  ;;  %v1884_v57 = vld [vmem:[#allocation7 + $0x60] sm:$0xff] }
 0x533   :  { %v601_v7 = vpop.xlane.xlu0 %600 }
 0x534   :  { %v3231_v58 = vpop.eup %2791  ;;  %2799 = vpow2.f32 %v1780_v6 }
 0x535   :  { %v931_v59 = vsel %vm260_vm6, %v3231_v58, 0.0  ;;  %2801 = vpow2.f32 %v431_v9 }
 0x536   :  { %v3235_v60 = vpop.eup %2793  ;;  %932 = vadd.xlane.f32.xlu0 %v931_v59 }
 0x537   :  { %v1450_v61 = vsel %vm260_vm6, %v3235_v60, 0.0 }
 0x538   :  { %v3239_v62 = vpop.eup %2795  ;;  %1451 = vadd.xlane.f32.xlu1 %v1450_v61 }
 0x539   :  { %v1284_v0 = vsel %vm260_vm6, %v3239_v62, 0.0 }
 0x53a   :  { %1285 = vadd.xlane.f32.xlu0 %v1284_v0 }
 0x53c   :  { %v3243_v1 = vpop.eup %2797 }
 0x53d   :  { %v1616_v2 = vsel %vm260_vm6, %v3243_v1, 0.0 }
 0x53e   :  { %1617 = vadd.xlane.f32.xlu1 %v1616_v2  ;;  %v3250_v10 = vpop.eup %2799 }
 0x53f   :  { %v1782_v11 = vsel %vm260_vm6, %v3250_v10, 0.0  ;;  %v2802_v12 = vpop.eup %2801 }
 0x540   :  { %v433_v15 = vsel %vm260_vm6, %v2802_v12, 0.0 }
 0x54f   :  { %604 = vrot.lane.b32.xlu1 %v3106_v19, %s2974_s27 }
 0x550   :  { %438 = vrot.lane.b32.xlu0 %v3106_v19, %s2975_s28 }
 0x56f   :  { %1783 = vadd.xlane.f32.xlu0 %v1782_v11 }
 0x573   :  { %434 = vadd.xlane.f32.xlu1 %v433_v15 }
 0x584   :  { %770 = vrot.lane.b32.xlu1 %v3106_v19, %s2976_s29 }
 0x588   :  { %936 = vrot.lane.b32.xlu1 %v3106_v19, %s2977_s0 }
 0x58c   :  { %1123 = vrot.lane.b32.xlu1 %v3104_v17, %s2964_s17 }
 0x590   :  { %1289 = vrot.lane.b32.xlu1 %v3104_v17, %s2975_s28 }
 0x594   :  { %1455 = vrot.lane.b32.xlu1 %v3104_v17, %s2974_s27 }
 0x598   :  { %1621 = vrot.lane.b32.xlu1 %v3104_v17, %s2976_s29 }
 0x59c   :  { %1787 = vrot.lane.b32.xlu1 %v3104_v17, %s2977_s0 }
 0x5bd   :  { %v1120_v19 = vpop.xlane.xlu1 %1119 }
 0x5c3   :  { %v933_v16 = vpop.xlane.xlu0 %932 }
 0x5c5   :  { %v1452_v22 = vpop.xlane.xlu1 %1451 }
 0x5c7   :  { %v1286_v18 = vpop.xlane.xlu0 %1285 }
 0x5cb   :  { %v439_v20 = vpop.permute.xlu0 %438  ;;  %v1618_v23 = vpop.xlane.xlu1 %1617 }
 0x5cc   :  { %2588 = vmatpush3.msra.mxu1 %v439_v20 }
 0x5cd   :  { %2597 = vmatprep.subr.mxu1 %v2962_v14 }
 0x5cf   :  { %v605_v24 = vpop.permute.xlu1 %604 }
 0x5fc   :  { %v1784_v39 = vpop.xlane.xlu0 %1783 }
 0x600   :  { %v435_v25 = vpop.xlane.xlu1 %434 }
 0x601   :  { %2803 = vrcp.f32 %v435_v25 }
 0x602   :  { %2805 = vrcp.f32 %v601_v7 }
 0x603   :  { %2807 = vrcp.f32 %v767_v21 }
 0x604   :  { %v771_v26 = vpop.permute.xlu1 %770  ;;  %2809 = vrcp.f32 %v933_v16 }
 0x605   :  { %2811 = vrcp.f32 %v1120_v19 }
 0x606   :  { %2813 = vrcp.f32 %v1286_v18 }
 0x607   :  { %2815 = vrcp.f32 %v1452_v22 }
 0x608   :  { %v937_v28 = vpop.permute.xlu1 %936  ;;  %2817 = vrcp.f32 %v1618_v23 }
 0x609   :  { %2819 = vrcp.f32 %v1784_v39 }
 0x60b   :  { %v2804_v27 = vpop.eup %2803 }
 0x60c   :  { %v437_v17 = vmul.f32 %v2804_v27, %v2802_v12  ;;  %v2806_v29 = vpop.eup %2805  ;;  %v1124_v32 = vpop.permute.xlu1 %1123 }
 0x60d   :  { %v603_v30 = vmul.f32 %v2806_v29, %v3221_v37  ;;  %v2808_v31 = vpop.eup %2807 }
 0x60e   :  { %2590 = vmatmul.mubr.msk.f32.vlgmr.msra.gmra.mrb[6].mxu1 %vm260_vm6, %v437_v17  ;;  %v769_v33 = vmul.f32 %v2808_v31, %v3218_v35  ;;  %v2810_v34 = vpop.eup %2809 }
 0x60f   :  { %2598 = vmatpush3.msra.mxu1 %v605_v24  ;;  %2599 = vmatprep.mubr.msk.f32.mxu1 %vm2963_vm4, %v2962_v14  ;;  %v935_v36 = vmul.f32 %v2810_v34, %v3231_v58  ;;  %v2812_v38 = vpop.eup %2811  ;;  %v1885_v58 = vld [vmem:[#allocation7 + $0x68] sm:$0xff] }
 0x610   :  { %2607 = vmatprep.subr.mxu1 %v2962_v14  ;;  %v1290_v37 = vpop.permute.xlu1 %1289  ;;  %v1122_v35 = vmul.f32 %v2812_v38, %v3227_v54  ;;  %v2814_v40 = vpop.eup %2813 }
 0x611   :  { %v1288_v42 = vmul.f32 %v2814_v40, %v3239_v62  ;;  %v2816_v43 = vpop.eup %2815  ;;  %v1886_v62 = vld [vmem:[#allocation7 + $0x70] sm:$0xff] }
 0x612   :  { %2600 = vmatmul.mubr.msk.f32.vlgmr.msra.gmra.mrb[8].mxu1 %vm260_vm6, %v603_v30  ;;  %v1454_v44 = vmul.f32 %v2816_v43, %v3235_v60  ;;  %v2818_v46 = vpop.eup %2817  ;;  %v2730_v60 = vpack.c.bf16 %v1885_v58, %v1884_v57 }
 0x613   :  { %2608 = vmatpush3.msra.mxu1 %v771_v26  ;;  %2609 = vmatprep.mubr.msk.f32.mxu1 %vm2963_vm4, %v2962_v14  ;;  %v1620_v47 = vmul.f32 %v2818_v46, %v3243_v1  ;;  %v2820_v48 = vpop.eup %2819 }
 0x614   :  { %2617 = vmatprep.subr.mxu1 %v2962_v14  ;;  %v1456_v41 = vpop.permute.xlu1 %1455  ;;  %v1786_v50 = vmul.f32 %v2820_v48, %v3250_v10  ;;  %2731 = vmatprep.subr.bf16.mxu0 %v2730_v60 }
 0x615   :  { %2733 = vmatpush3.bf16.msra.mxu0 %v2730_v60 }
 0x616   :  { %2610 = vmatmul.mubr.msk.f32.vlgmr.msra.gmra.mrb[10].mxu1 %vm260_vm6, %v769_v33  ;;  %2676 = vmatprep.subr.msk.mxu0 %vm100_vm1, %v1886_v62 }
 0x617   :  { %2618 = vmatpush3.msra.mxu1 %v937_v28  ;;  %2619 = vmatprep.mubr.msk.f32.mxu1 %vm2963_vm4, %v2962_v14  ;;  %v3322_v28 = vld [vmem:[#allocation8] sm:$0xff] }
 0x618   :  { %2627 = vmatprep.subr.mxu1 %v2962_v14  ;;  %v1622_v45 = vpop.permute.xlu1 %1621 }
 0x619   :  { %2677 = vmatpush3.msk.msra.mxu0 %vm100_vm1, %v1886_v62 }
 0x61a   :  { %2620 = vmatmul.mubr.msk.f32.vlgmr.msra.gmra.mrb[12].mxu1 %vm260_vm6, %v935_v36 }
 0x61b   :  { %2628 = vmatpush3.msra.mxu1 %v1124_v32  ;;  %2629 = vmatprep.mubr.msk.f32.mxu1 %vm2963_vm4, %v2962_v14 }
 0x61c   :  { %2637 = vmatprep.subr.mxu1 %v2962_v14  ;;  %v1788_v49 = vpop.permute.xlu1 %1787 }
 0x61e   :  { %2630 = vmatmul.mubr.msk.f32.vlgmr.msra.gmra.mrb[14].mxu1 %vm260_vm6, %v1122_v35 }
 0x61f   :  { %2638 = vmatpush3.msra.mxu1 %v1290_v37  ;;  %2639 = vmatprep.mubr.msk.f32.mxu1 %vm2963_vm4, %v2962_v14 }
 0x620   :  { %2647 = vmatprep.subr.mxu1 %v2962_v14 }
 0x622   :  { %2640 = vmatmul.mubr.msk.f32.vlgmr.msra.gmra.mrb[16].mxu1 %vm260_vm6, %v1288_v42 }
 0x623   :  { %2648 = vmatpush3.msra.mxu1 %v1456_v41  ;;  %2649 = vmatprep.mubr.msk.f32.mxu1 %vm2963_vm4, %v2962_v14 }
 0x624   :  { %2657 = vmatprep.subr.mxu1 %v2962_v14 }
 0x626   :  { %2650 = vmatmul.mubr.msk.f32.vlgmr.msra.gmra.mrb[18].mxu1 %vm260_vm6, %v1454_v44 }
 0x627   :  { %2658 = vmatpush3.msra.mxu1 %v1622_v45  ;;  %2659 = vmatprep.mubr.msk.f32.mxu1 %vm2963_vm4, %v2962_v14 }
 0x628   :  { %2667 = vmatprep.subr.mxu1 %v2962_v14 }
 0x62a   :  { %2660 = vmatmul.mubr.msk.f32.vlgmr.msra.gmra.mrb[20].mxu1 %vm260_vm6, %v1620_v47 }
 0x62b   :  { %2668 = vmatpush3.msra.mxu1 %v1788_v49  ;;  %2669 = vmatprep.mubr.msk.f32.mxu1 %vm2963_vm4, %v2962_v14 }
 0x62e   :  { %2670 = vmatmul.mubr.msk.f32.vlgmr.msra.gmra.mrb[22].mxu1 %vm260_vm6, %v1786_v50  ;;  %v2023_v50 = vld [vmem:[#allocation7] sm:$0xff] }
 0x6e1   :  { %v510_v51 = vpop.f32.mrb[6].mxu1 }
 0x6e2   :  { %1013 = vrot.lane.b32.xlu1 %v510_v51, %s2978_s21  ;;  %v2591_v52 = vpop.f32.mrb[7].mxu1  ;;  %v2024_v51 = vld [vmem:[#allocation7 + $0x8] sm:$0xff] }
 0x6e3   :  { %v2734_v52 = vpack.c.bf16 %v2024_v51, %v2023_v50 }
 0x6e5   :  { %v676_v53 = vpop.f32.mrb[8].mxu1  ;;  %2735 = vmatprep.subr.bf16.mxu1 %v2734_v52 }
 0x6e6   :  { %1017 = vrot.lane.b32.xlu0 %v676_v53, %s2958_s6  ;;  %v2601_v54 = vpop.f32.mrb[9].mxu1  ;;  %2737 = vmatpush3.bf16.msra.mxu1 %v2734_v52  ;;  %v2025_v53 = vld [vmem:[#allocation7 + $0x10] sm:$0xff] }
 0x6e7   :  { %2685 = vmatprep.subr.msk.mxu1 %vm100_vm1, %v2025_v53 }
 0x6e9   :  { %v842_v55 = vpop.f32.mrb[10].mxu1 }
 0x6ea   :  { %1021 = vrot.lane.b32.xlu1 %v842_v55, %s2979_s7  ;;  %v2611_v56 = vpop.f32.mrb[11].mxu1  ;;  %1976 = vrot.lane.b32.xlu0 %v3086_v8, %s2964_s17 }
 0x6eb   :  { %2686 = vmatpush3.msk.msra.mxu1 %vm100_vm1, %v2025_v53 }
 0x6ed   :  { %v1008_v14 = vpop.f32.mrb[12].mxu1 }
 0x6ee   :  { %1025 = vrot.lane.b32.xlu1 %v1008_v14, %s2980_s8  ;;  %v2621_v59 = vpop.f32.mrb[13].mxu1 }
 0x6f1   :  { %v1195_v61 = vpop.f32.mrb[14].mxu1 }
 0x6f2   :  { %v2631_v0 = vpop.f32.mrb[15].mxu1 }
 0x6f5   :  { %v1361_v1 = vpop.f32.mrb[16].mxu1 }
 0x6f6   :  { %1864 = vrot.lane.b32.xlu1 %v1361_v1, %s2978_s21  ;;  %v2641_v2 = vpop.f32.mrb[17].mxu1 }
 0x6f9   :  { %v1527_v8 = vpop.f32.mrb[18].mxu1 }
 0x6fa   :  { %1868 = vrot.lane.b32.xlu1 %v1527_v8, %s2958_s6  ;;  %v2651_v3 = vpop.f32.mrb[19].mxu1 }
 0x6fd   :  { %v1693_v4 = vpop.f32.mrb[20].mxu1 }
 0x6fe   :  { %1872 = vrot.lane.b32.xlu1 %v1693_v4, %s2979_s7  ;;  %v2661_v5 = vpop.f32.mrb[21].mxu1 }
 0x701   :  { %v1859_v6 = vpop.f32.mrb[22].mxu1 }
 0x702   :  { %1876 = vrot.lane.b32.xlu1 %v1859_v6, %s2980_s8  ;;  %v2671_v9 = vpop.f32.mrb[23].mxu1 }
 0x706   :  { %1978 = vrot.lane.b32.xlu1 %v3091_v13, %s2964_s17 }
 0x754   :  { %v1014_v10 = vpop.permute.xlu1 %1013 }
 0x755   :  { %v1028_v15 = vsel %vm184_vm5, %v3206_v63, %v1014_v10  ;;  %v1887_v63 = vlaneseq }
 0x757   :  { %v3319_v27 = vshrl.u32 %v1887_v63, 7 }
 0x758   :  { %v1018_v11 = vpop.permute.xlu0 %1017 }
 0x759   :  { %v1029_v7 = vsel %vm260_vm6, %v1028_v15, %v1018_v11  ;;  %v1889_v17 = vsub.s32 0, %v3319_v27  ;;  %v2013_v59 = vsub.s32 1, %v3319_v27  ;;  %v2019_v60 = vsub.s32 2, %v3319_v27 }
 0x75a   :  { %v2038_v9 = vsub.s32 3, %v3319_v27 }
 0x75b   :  { %v1890_v29 = vrot.slane %v3322_v28, %v1889_v17  ;;  %v2020_v1 = vrot.slane %v3322_v28, %v2019_v60 }
 0x75c   :  { %v1022_v12 = vpop.permute.xlu1 %1021  ;;  %v1977_v34 = vpop.permute.xlu0 %1976  ;;  %v2039_v10 = vrot.slane %v3322_v28, %v2038_v9 }
 0x75d   :  { %v1031_v16 = vsel %vm1030_vm7, %v1029_v7, %v1022_v12 }
 0x760   :  { %v1026_v18 = vpop.permute.xlu1 %1025 }
 0x761   :  { %v1033_v20 = vsel %vm1032_vm8, %v1031_v16, %v1026_v18 }
 0x762   :  { %2678 = vmatprep.mubr.msk.f32.mxu0 %vm1891_vm9, %v1033_v20 }
 0x768   :  { %v1865_v21 = vpop.permute.xlu1 %1864 }
 0x769   :  { %v1879_v13 = vsel %vm184_vm5, %v1195_v61, %v1865_v21  ;;  %v2014_v61 = vrot.slane %v3322_v28, %v2013_v59 }
 0x76c   :  { %v1869_v19 = vpop.permute.xlu1 %1868 }
 0x76d   :  { %v1880_v23 = vsel %vm260_vm6, %v1879_v13, %v1869_v19 }
 0x770   :  { %v1873_v22 = vpop.permute.xlu1 %1872 }
 0x771   :  { %v1881_v24 = vsel %vm1030_vm7, %v1880_v23, %v1873_v22 }
 0x774   :  { %v1877_v25 = vpop.permute.xlu1 %1876 }
 0x775   :  { %v1882_v26 = vsel %vm1032_vm8, %v1881_v24, %v1877_v25 }
 0x776   :  { %2679 = vmatmul.mubr.msk.f32.vlgmr.msra.gmra.mrb[18].mxu0 %vm1891_vm9, %v1882_v26 }
 0x778   :  { %v1979_v31 = vpop.permute.xlu1 %1978 }
 0x849   :  { %v2680_v30 = vpop.f32.mrb[18].mxu0 }
 0x84a   :  { %v1973_v32 = vadd.f32 %v2680_v30, %v1890_v29  ;;  %v1967_v33 = vpop.f32.mrb[19].mxu0  ;;  %v2028_v30 = vld [vmem:[#allocation7 + $0x28] sm:$0xff] }
 0x84b   :  { %v1968_v36 = vadd.f32 %v1967_v33, %v1890_v29  ;;  %v2027_v29 = vld [vmem:[#allocation7 + $0x20] sm:$0xff]  ;;  %v2030_v33 = vld [vmem:[#allocation7 + $0x38] sm:$0xff] }
 0x84c   :  { %v1983_v37 = vadd.f32 %v1979_v31, %v1973_v32  ;;  %v2029_v31 = vld [vmem:[#allocation7 + $0x30] sm:$0xff]  ;;  %v2738_v32 = vpack.c.bf16 %v2028_v30, %v2027_v29  ;;  %v2279_v29 = vsub.s32 7, %v3319_v27  ;;  %v180_v30 = vld [vmem:[#allocation8 + $0x8] sm:$0xf] }
 0x84d   :  { %v1982_v38 = vadd.f32 %v1977_v34, %v1968_v36  ;;  %v2742_v34 = vpack.c.bf16 %v2030_v33, %v2029_v31 }
 0x84e   :  { %v1987_v35 = vsel %vm1891_vm9, %v1983_v37, 0.0  ;;  %2739 = vmatprep.subr.bf16.mxu0 %v2738_v32  ;;  %v2280_v31 = vrot.slane %v3322_v28, %v2279_v29 }
 0x84f   :  { %1988 = vadd.xlane.f32.xlu1 %v1987_v35  ;;  %v1984_v39 = vsel %vm1891_vm9, %v1982_v38, 0.0  ;;  %2741 = vmatpush3.bf16.msra.mxu0 %v2738_v32 }
 0x850   :  { %1985 = vadd.xlane.f32.xlu0 %v1984_v39  ;;  %2743 = vmatprep.subr.bf16.mxu0 %v2742_v34 }
 0x853   :  { %2745 = vmatpush3.bf16.msra.mxu0 %v2742_v34  ;;  %v2286_v34 = vrot.slane %v180_v30, %v1889_v17 }
 0x8dc   :  { %v1989_v40 = vpop.xlane.xlu1 %1988 }
 0x8dd   :  { %v1992_v41 = vmul.f32 0.05, %v1989_v40  ;;  %v1986_v42 = vpop.xlane.xlu0 %1985 }
 0x8de   :  { %v1991_v43 = vmul.f32 0.05, %v1986_v42  ;;  %v2160_v42 = vsub.s32 5, %v3319_v27 }
 0x8df   :  { %v1994_v44 = vsub.f32 %v1983_v37, %v1992_v41  ;;  %v2154_v41 = vsub.s32 4, %v3319_v27 }
 0x8e0   :  { %v1993_v45 = vsub.f32 %v1982_v38, %v1991_v43 }
 0x8e1   :  { %v1996_v48 = vmul.f32 %v1994_v44, %v1994_v44  ;;  %v2155_v43 = vrot.slane %v3322_v28, %v2154_v41 }
 0x8e2   :  { %v1995_v46 = vmul.f32 %v1993_v45, %v1993_v45 }
 0x8e3   :  { %v2000_v49 = vsel %vm1891_vm9, %v1996_v48, 0.0 }
 0x8e4   :  { %v1997_v47 = vsel %vm1891_vm9, %v1995_v46, 0.0 }
 0x8e5   :  { %1998 = vadd.xlane.f32.xlu0 %v1997_v47  ;;  %v2161_v47 = vrot.slane %v3322_v28, %v2160_v42 }
 0x8e9   :  { %2001 = vadd.xlane.f32.xlu0 %v2000_v49 }
 0x972   :  { %v1999_v54 = vpop.xlane.xlu0 %1998 }
 0x973   :  { %v2003_v55 = vmul.f32 0.05, %v1999_v54 }
 0x975   :  { %v2005_v56 = vadd.f32 1e-05, %v2003_v55  ;;  %v2168_v55 = vsub.s32 6, %v3319_v27 }
 0x976   :  { %v2002_v14 = vpop.xlane.xlu0 %2001 }
 0x977   :  { %2821 = vrsqrt.f32 %v2005_v56  ;;  %v2004_v57 = vmul.f32 0.05, %v2002_v14  ;;  %v2169_v56 = vrot.slane %v3322_v28, %v2168_v55  ;;  %v2294_v28 = vrot.slane %v180_v30, %v2013_v59 }
 0x979   :  { %v2006_v58 = vadd.f32 1e-05, %v2004_v57 }
 0x97b   :  { %2823 = vrsqrt.f32 %v2006_v58 }
 0x981   :  { %v2822_v62 = vpop.eup %2821 }
 0x982   :  { %v2009_v0 = vmul.f32 %v2822_v62, %v1993_v45 }
 0x984   :  { %v2015_v2 = vmul.f32 %v2014_v61, %v2009_v0 }
 0x985   :  { %v2824_v8 = vpop.eup %2823 }
 0x986   :  { %v2010_v3 = vmul.f32 %v2824_v8, %v1994_v44  ;;  %v3341_v4 = vadd.f32 %v2020_v1, %v2015_v2 }
 0x988   :  { %v2016_v5 = vmul.f32 %v2014_v61, %v2010_v3  ;;  %2687 = vmatprep.mubr.msk.f32.mxu1 %vm1891_vm9, %v3341_v4 }
 0x98a   :  { %v3345_v6 = vadd.f32 %v2020_v1, %v2016_v5 }
 0x98c   :  { %2688 = vmatmul.mubr.msk.f32.vlgmr.msra.gmra.mrb[24].mxu1 %vm1891_vm9, %v3345_v6 }
 0xa5f   :  { %v2689_v11 = vpop.f32.mrb[24].mxu1 }
 0xa60   :  { %v2121_v12 = vadd.f32 %v2689_v11, %v2039_v10  ;;  %v2115_v15 = vpop.f32.mrb[25].mxu1 }
 0xa61   :  { %v2116_v7 = vadd.f32 %v2115_v15, %v2039_v10 }
 0xa62   :  { %v2128_v16 = vsel %vm2124_vm10, %v2121_v12, 0.0 }
 0xa63   :  { %2129 = vadd.xlane.f32.xlu1 %v2128_v16  ;;  %v2125_v18 = vsel %vm2124_vm10, %v2116_v7, 0.0  ;;  %v2032_v16 = vld [vmem:[#allocation7 + $0x40] sm:$0xff] }
 0xa64   :  { %2126 = vadd.xlane.f32.xlu0 %v2125_v18  ;;  %v2033_v18 = vld [vmem:[#allocation7 + $0x48] sm:$0xff] }
 0xaf0   :  { %v2130_v20 = vpop.xlane.xlu1 %2129 }
 0xaf1   :  { %v2133_v21 = vmul.f32 0.03125, %v2130_v20  ;;  %v2127_v19 = vpop.xlane.xlu0 %2126  ;;  %v2034_v20 = vld [vmem:[#allocation7 + $0x50] sm:$0xff] }
 0xaf2   :  { %v2132_v22 = vmul.f32 0.03125, %v2127_v19  ;;  %v2035_v19 = vld [vmem:[#allocation7 + $0x58] sm:$0xff] }
 0xaf3   :  { %v2135_v13 = vsub.f32 %v2121_v12, %v2133_v21  ;;  %v2746_v21 = vpack.c.bf16 %v2033_v18, %v2032_v16 }
 0xaf4   :  { %v2134_v23 = vsub.f32 %v2116_v7, %v2132_v22  ;;  %v2750_v22 = vpack.c.bf16 %v2035_v19, %v2034_v20 }
 0xaf5   :  { %v2137_v24 = vmul.f32 %v2135_v13, %v2135_v13  ;;  %2747 = vmatprep.subr.bf16.mxu1 %v2746_v21 }
 0xaf6   :  { %v2136_v25 = vmul.f32 %v2134_v23, %v2134_v23  ;;  %2749 = vmatpush3.bf16.msra.mxu1 %v2746_v21 }
 0xaf7   :  { %v2141_v26 = vsel %vm2124_vm10, %v2137_v24, 0.0  ;;  %2751 = vmatprep.subr.bf16.mxu1 %v2750_v22 }
 0xaf8   :  { %2142 = vadd.xlane.f32.xlu1 %v2141_v26  ;;  %v2138_v63 = vsel %vm2124_vm10, %v2136_v25, 0.0 }
 0xaf9   :  { %2139 = vadd.xlane.f32.xlu0 %v2138_v63 }
 0xafa   :  { %2753 = vmatpush3.bf16.msra.mxu1 %v2750_v22 }
 0xb85   :  { %v2143_v36 = vpop.xlane.xlu1 %2142 }
 0xb86   :  { %v2145_v37 = vmul.f32 0.03125, %v2143_v36  ;;  %v2140_v38 = vpop.xlane.xlu0 %2139 }
 0xb87   :  { %v2144_v35 = vmul.f32 0.03125, %v2140_v38 }
 0xb88   :  { %v2147_v39 = vadd.f32 1e-05, %v2145_v37 }
 0xb89   :  { %v2146_v40 = vadd.f32 1e-05, %v2144_v35 }
 0xb8a   :  { %2825 = vrsqrt.f32 %v2147_v39 }
 0xb8b   :  { %2827 = vrsqrt.f32 %v2146_v40 }
 0xb94   :  { %v2826_v44 = vpop.eup %2825 }
 0xb95   :  { %v2828_v45 = vpop.eup %2827  ;;  %v2151_v46 = vmul.f32 %v2826_v44, %v2135_v13 }
 0xb96   :  { %v2150_v48 = vmul.f32 %v2828_v45, %v2134_v23 }
 0xb97   :  { %v2157_v49 = vmul.f32 %v2155_v43, %v2151_v46 }
 0xb98   :  { %v2156_v50 = vmul.f32 %v2155_v43, %v2150_v48 }
 0xb99   :  { %v2163_v51 = vadd.f32 %v2161_v47, %v2157_v49 }
 0xb9a   :  { %v2162_v52 = vadd.f32 %v2161_v47, %v2156_v50 }
 0xb9b   :  { %v2165_v54 = vmax.f32 %v2163_v51, 0.0 }
 0xb9c   :  { %v2164_v53 = vmax.f32 %v2162_v52, 0.0 }
 0xb9e   :  { %2698 = vmatprep.mubr.msk.f32.mxu0 %vm2124_vm10, %v2164_v53 }
 0xb9f   :  { %2699 = vmatmul.mubr.msk.f32.vlgmr.msra.gmra.mrb[20].mxu0 %vm2124_vm10, %v2165_v54 }
 0xc72   :  { %v2700_v14 = vpop.f32.mrb[20].mxu0 }
 0xc73   :  { %v2248_v57 = vadd.f32 %v2700_v14, %v2169_v56  ;;  %v2242_v58 = vpop.f32.mrb[21].mxu0 }
 0xc74   :  { %v2243_v61 = vadd.f32 %v2242_v58, %v2169_v56 }
 0xc75   :  { %v2254_v62 = vsel %vm2124_vm10, %v2248_v57, 0.0 }
 0xc76   :  { %2255 = vadd.xlane.f32.xlu1 %v2254_v62  ;;  %v2251_v0 = vsel %vm2124_vm10, %v2243_v61, 0.0 }
 0xc77   :  { %2252 = vadd.xlane.f32.xlu0 %v2251_v0 }
 0xd03   :  { %v2256_v1 = vpop.xlane.xlu1 %2255 }
 0xd04   :  { %v2258_v2 = vmul.f32 0.03125, %v2256_v1  ;;  %v2253_v8 = vpop.xlane.xlu0 %2252  ;;  %v2407_v1 = vrot.slane %v180_v30, %v2019_v60 }
 0xd05   :  { %v2257_v3 = vmul.f32 0.03125, %v2253_v8 }
 0xd06   :  { %v2260_v5 = vsub.f32 %v2248_v57, %v2258_v2 }
 0xd07   :  { %v2259_v10 = vsub.f32 %v2243_v61, %v2257_v3  ;;  %v2413_v3 = vrot.slane %v180_v30, %v2038_v9 }
 0xd08   :  { %v2262_v11 = vmul.f32 %v2260_v5, %v2260_v5 }
 0xd09   :  { %v2261_v12 = vmul.f32 %v2259_v10, %v2259_v10 }
 0xd0a   :  { %v2266_v15 = vsel %vm2124_vm10, %v2262_v11, 0.0 }
 0xd0b   :  { %2267 = vadd.xlane.f32.xlu1 %v2266_v15  ;;  %v2263_v7 = vsel %vm2124_vm10, %v2261_v12, 0.0 }
 0xd0c   :  { %2264 = vadd.xlane.f32.xlu0 %v2263_v7 }
 0xd98   :  { %v2268_v13 = vpop.xlane.xlu1 %2267 }
 0xd99   :  { %v2270_v23 = vmul.f32 0.03125, %v2268_v13  ;;  %v2265_v24 = vpop.xlane.xlu0 %2264 }
 0xd9a   :  { %v2269_v25 = vmul.f32 0.03125, %v2265_v24 }
 0xd9b   :  { %v2272_v26 = vadd.f32 1e-05, %v2270_v23 }
 0xd9c   :  { %v2271_v63 = vadd.f32 1e-05, %v2269_v25 }
 0xd9d   :  { %2829 = vrsqrt.f32 %v2272_v26 }
 0xd9e   :  { %2831 = vrsqrt.f32 %v2271_v63 }
 0xda7   :  { %v2830_v32 = vpop.eup %2829 }
 0xda8   :  { %v2832_v33 = vpop.eup %2831  ;;  %v2276_v36 = vmul.f32 %v2830_v32, %v2260_v5 }
 0xda9   :  { %v2275_v37 = vmul.f32 %v2832_v33, %v2259_v10 }
 0xdaa   :  { %v2282_v38 = vmul.f32 %v2280_v31, %v2276_v36 }
 0xdab   :  { %v2281_v35 = vmul.f32 %v2280_v31, %v2275_v37 }
 0xdac   :  { %v2288_v39 = vadd.f32 %v2286_v34, %v2282_v38 }
 0xdad   :  { %v2287_v40 = vadd.f32 %v2286_v34, %v2281_v35 }
 0xdae   :  { %v2290_v42 = vmax.f32 %v2288_v39, 0.0 }
 0xdaf   :  { %v2289_v41 = vmax.f32 %v2287_v40, 0.0 }
 0xdb1   :  { %2709 = vmatprep.mubr.msk.f32.mxu1 %vm2124_vm10, %v2289_v41 }
 0xdb2   :  { %2710 = vmatmul.mubr.msk.f32.vlgmr.msra.gmra.mrb[26].mxu1 %vm2124_vm10, %v2290_v42 }
 0xe85   :  { %v2711_v43 = vpop.f32.mrb[26].mxu1 }
 0xe86   :  { %v2373_v44 = vadd.f32 %v2711_v43, %v2294_v28  ;;  %v2367_v45 = vpop.f32.mrb[27].mxu1 }
 0xe87   :  { %v2368_v46 = vadd.f32 %v2367_v45, %v2294_v28 }
 0xe88   :  { %v2377_v17 = vadd.f32 %v2373_v44, %v3345_v6 }
 0xe89   :  { %v2376_v47 = vadd.f32 %v2368_v46, %v3341_v4 }
 0xe8a   :  { %v2381_v48 = vsel %vm1891_vm9, %v2377_v17, 0.0 }
 0xe8b   :  { %2382 = vadd.xlane.f32.xlu1 %v2381_v48  ;;  %v2378_v49 = vsel %vm1891_vm9, %v2376_v47, 0.0 }
 0xe8c   :  { %2379 = vadd.xlane.f32.xlu0 %v2378_v49 }
 0xf18   :  { %v2383_v50 = vpop.xlane.xlu1 %2382 }
 0xf19   :  { %v2385_v51 = vmul.f32 0.05, %v2383_v50  ;;  %v2380_v52 = vpop.xlane.xlu0 %2379 }
 0xf1a   :  { %v2384_v53 = vmul.f32 0.05, %v2380_v52 }
 0xf1b   :  { %v2387_v54 = vsub.f32 %v2377_v17, %v2385_v51 }
 0xf1c   :  { %v2386_v59 = vsub.f32 %v2376_v47, %v2384_v53 }
 0xf1d   :  { %v2389_v55 = vmul.f32 %v2387_v54, %v2387_v54 }
 0xf1e   :  { %v2388_v56 = vmul.f32 %v2386_v59, %v2386_v59 }
 0xf1f   :  { %v2393_v14 = vsel %vm1891_vm9, %v2389_v55, 0.0 }
 0xf20   :  { %2394 = vadd.xlane.f32.xlu1 %v2393_v14  ;;  %v2390_v6 = vsel %vm1891_vm9, %v2388_v56, 0.0 }
 0xf21   :  { %2391 = vadd.xlane.f32.xlu0 %v2390_v6 }
 0xfad   :  { %v2395_v4 = vpop.xlane.xlu1 %2394 }
 0xfae   :  { %v2397_v57 = vmul.f32 0.05, %v2395_v4  ;;  %v2392_v58 = vpop.xlane.xlu0 %2391 }
 0xfaf   :  { %v2396_v61 = vmul.f32 0.05, %v2392_v58 }
 0xfb0   :  { %v2399_v62 = vadd.f32 1e-05, %v2397_v57 }
 0xfb1   :  { %v2398_v0 = vadd.f32 1e-05, %v2396_v61 }
 0xfb2   :  { %2833 = vrsqrt.f32 %v2399_v62 }
 0xfb3   :  { %2835 = vrsqrt.f32 %v2398_v0 }
 0xfbc   :  { %v2834_v2 = vpop.eup %2833 }
 0xfbd   :  { %v2836_v8 = vpop.eup %2835  ;;  %v2403_v5 = vmul.f32 %v2834_v2, %v2387_v54 }
 0xfbe   :  { %v2402_v10 = vmul.f32 %v2836_v8, %v2386_v59 }
 0xfbf   :  { %v2409_v11 = vmul.f32 %v2407_v1, %v2403_v5 }
 0xfc0   :  { %v2408_v12 = vmul.f32 %v2407_v1, %v2402_v10 }
 0xfc1   :  { %v2415_v15 = vadd.f32 %v2413_v3, %v2409_v11 }
 0xfc2   :  { %v2414_v7 = vadd.f32 %v2413_v3, %v2408_v12 }
 0xfc3   :  { %2417 = vst.msk [vmem:[#allocation10 + $0x8] sm:$0xff] %vm1891_vm9, %v2415_v15 }
 0xfc4   :  { %2416 = vst.msk [vmem:[#allocation10] sm:$0xff] %vm1891_vm9, %v2414_v7 }
 0xfc5   :  { %2936 = shalt.err (!%p2933_p8)
}
 0xfc6   :  { %s2937_s14 = scalar_lea.hbm %s3409_s5, 256 }
 0xfc7   :  { %p2938_p9 = scmp.ne.s32.totalorder %s3409_s5, %s2937_s14  ;;  %p2941_p10 = scmp.lt.u32.totalorder %s2937_s14, %s3409_s5 }
 0xfc9   :  { %p2943_p11 = pnand %p2941_p10, %p2938_p9 }
 0xfcb   :  { %2946 = shalt.err (!%p2943_p11)
}
 0xfcc   :  { %2429 = dma.vmem_to_hbm [thread:$0]  %s2424_s10, 256, %s3409_s5, [#allocation4], %s2957_s30, %s2957_s30, %s2958_s6  }
 0xfcd   :  { %2953 = dma.done.wait [#allocation4], 256  }
 0xfce   :  { %2954 = vsyncadd [#allocation4], 4294967040 }
 0xfcf   :  { %2433 = vsyncpa [#allocation3], 1 }
 0xfd0   :  { %2434 = vsyncpa [#allocation6], 1 }
 0xfd1   :  { %2435 = vsyncpa [#allocation9], 1 }
 0xfd2   :  { %2436 = vsyncpa [#allocation4], 1 }

</bundles_post_ra>
